<compile_context>
chip_gen: v6e
topology: v6e:2x2x1
jax: 0.10.0
libtpu: 0.0.40
codegen_flags: <defaults>
</compile_context>

<pallas_src>
import functools

import jax
import jax.numpy as jnp
from jax.experimental import pallas as pl
from jax.experimental.pallas import tpu as pltpu


def _depthwise_conv_kernel(x_ref, w_ref, o_ref, *maybe_pad, k_size, stride,
                           padding, out_h, out_w):
    """One (channel-tile, batch) block of a depthwise grouped conv.

    x_ref     : (1, H, W, Gc)      unpadded input block (VMEM, auto-pipelined)
    w_ref     : (k, k, Gc)         per-channel filters (VMEM)
    o_ref     : (1, Ho, Wo, Gc)    output block (VMEM)
    maybe_pad : ((1, Hp, Wp, Gc),) VMEM scratch holding the zero-padded tile,
                present only when padding > 0.
    """
    _, H, W, C = x_ref.shape

    if padding > 0:
        xpad_ref = maybe_pad[0]
        _, Hp, Wp, _ = xpad_ref.shape
        # Zero only the border strips; the interior is fully overwritten below.
        zrow = jnp.zeros((1, padding, Wp, C), xpad_ref.dtype)
        xpad_ref[:, :padding, :, :] = zrow
        xpad_ref[:, Hp - padding:, :, :] = zrow
        zcol = jnp.zeros((1, H, padding, C), xpad_ref.dtype)
        xpad_ref[:, padding:padding + H, :padding, :] = zcol
        xpad_ref[:, padding:padding + H, Wp - padding:, :] = zcol
        xpad_ref[:, padding:padding + H, padding:padding + W, :] = x_ref[...]
        src = xpad_ref
    else:
        src = x_ref

    # (k, k, Gc): a handful of vregs, loaded once per grid step.  Hoist the
    # per-tap slices out of the row loop (broadcasts are not CSE'd otherwise).
    w = w_ref[...].astype(jnp.float32)
    w_taps = [[w[a, b, :] for b in range(k_size)] for a in range(k_size)]

    # Row-wise accumulation: only one output row of the f32 accumulator is
    # ever live, so the channel tile can stay wide without register spills.
    for i in range(out_h):
        acc = jnp.zeros((1, 1, out_w, C), jnp.float32)
        for a in range(k_size):
            row = i * stride + a
            for b in range(k_size):
                if stride == 1:
                    patch = src[:, row:row + 1, b:b + out_w, :]
                else:
                    # Sublane-strided read straight from VMEM.
                    # TODO(synk): stride > 1 path is not exercised by this
                    # model's configs; falls back to pl.ds strided reads.
                    patch = src[:, row:row + 1, pl.ds(b, out_w, stride), :]
                acc = acc + patch.astype(jnp.float32) * w_taps[a][b]
        o_ref[:, i:i + 1, :, :] = acc.astype(o_ref.dtype)


def _pick_channel_tile(G, H, W, Hp, Wp, Ho, Wo, k_size, padding, itemsize,
                       vmem_budget_bytes=24 * 1024 * 1024):
    """Largest 128-multiple channel tile under a VMEM / vreg budget."""
    per_ch = itemsize * (2 * H * W              # double-buffered input block
                         + 2 * k_size * k_size  # double-buffered weights
                         + 2 * Ho * Wo)         # double-buffered output block
    if padding > 0:
        per_ch += itemsize * Hp * Wp            # padded VMEM scratch
    gc = (vmem_budget_bytes // per_ch) // 128 * 128
    gc = max(128, min(gc, 2048))
    # Bound the register-resident f32 row accumulator / patch (~16 vregs each).
    row_cap = (64 * 1024 // (Wo * 4)) // 128 * 128
    gc = min(gc, max(128, row_cap))
    # Never wider than the lane-padded channel count.
    gc = min(gc, -(-G // 128) * 128)
    return int(gc)


def conv_layer_forward(x, kernels, B, *, dim, k_size, stride, padding,
                       ka_win_num, if_global=True):
    """Pallas implementation of ConvLayer.forward.

    x       : (N, G, H, W)  (NCHW, like the PyTorch module)
    kernels : (G, 1, k, k)  depthwise grouped-conv weights
    """
    nW = ka_win_num
    G = B * (nW + 1) * dim if if_global else B * nW * dim

    N, C, H, W = x.shape
    assert C == G, f"input channels {C} must equal groups {G}"
    assert kernels.shape == (G, 1, k_size, k_size), kernels.shape
    # TODO(synk): only the depthwise case (in_channels == groups, one filter
    # per group) is implemented, which is the only way this module is used.
    # TODO(synk): very large spatial maps would additionally need spatial
    # tiling with halos; this model only calls it on window-level maps.

    Ho = (H + 2 * padding - k_size) // stride + 1
    Wo = (W + 2 * padding - k_size) // stride + 1
    Hp = H + 2 * padding
    Wp = W + 2 * padding

    itemsize = jnp.dtype(x.dtype).itemsize
    gc = _pick_channel_tile(G, H, W, Hp, Wp, Ho, Wo, k_size, padding, itemsize)
    Gp = -(-G // gc) * gc            # lane-dense, divisible by the channel tile

    # NCHW -> NHWC, channels padded up to a multiple of the 128-lane tile.
    # Spatial zero-padding happens inside the kernel (no extra HBM pass).
    # TODO(synk): if the surrounding model kept NHWC activations end-to-end,
    # these two transposes (and the channel pad) would disappear entirely.
    x_nhwc = jnp.transpose(x, (0, 2, 3, 1))
    w_kkc = jnp.transpose(kernels[:, 0, :, :], (1, 2, 0))
    if Gp != G:
        x_nhwc = jnp.pad(x_nhwc, ((0, 0), (0, 0), (0, 0), (0, Gp - G)))
        w_kkc = jnp.pad(w_kkc, ((0, 0), (0, 0), (0, Gp - G)))

    kernel = functools.partial(
        _depthwise_conv_kernel, k_size=k_size, stride=stride, padding=padding,
        out_h=Ho, out_w=Wo)

    scratch_shapes = []
    if padding > 0:
        scratch_shapes.append(pltpu.VMEM((1, Hp, Wp, gc), x.dtype))

    # VMEM footprint: double-buffered in/out/weight blocks (+ padded scratch).
    vmem_est = itemsize * gc * (2 * H * W + 2 * k_size * k_size + 2 * Ho * Wo
                                + (Hp * Wp if padding > 0 else 0))
    vmem_limit = int(min(48 * 1024 * 1024,
                         max(32 * 1024 * 1024, 2 * vmem_est)))

    cost = pl.CostEstimate(
        flops=int(2 * k_size * k_size * N * Ho * Wo * Gp),
        transcendentals=0,
        bytes_accessed=int(itemsize * (N * Gp * (H * W + Ho * Wo)
                                       + Gp * k_size * k_size)))

    out_nhwc = pl.pallas_call(
        kernel,
        out_shape=jax.ShapeDtypeStruct((N, Ho, Wo, Gp), x.dtype),
        grid_spec=pltpu.PrefetchScalarGridSpec(
            num_scalar_prefetch=0,
            # Channel tiles outer: the (k,k,gc) weight block index stays fixed
            # while the batch index varies, so it is never re-fetched.
            grid=(Gp // gc, N),
            in_specs=[
                pl.BlockSpec((1, H, W, gc), lambda c, n: (n, 0, 0, c)),
                pl.BlockSpec((k_size, k_size, gc), lambda c, n: (0, 0, c)),
            ],
            out_specs=pl.BlockSpec((1, Ho, Wo, gc), lambda c, n: (n, 0, 0, c)),
            scratch_shapes=scratch_shapes,
        ),
        compiler_params=pltpu.CompilerParams(
            dimension_semantics=("parallel", "parallel"),
            vmem_limit_bytes=vmem_limit,
        ),
        cost_estimate=cost,
    )(x_nhwc, w_kkc)

    # Drop lane padding, NHWC -> NCHW.
    return jnp.transpose(out_nhwc[..., :G], (0, 3, 1, 2))


if __name__ == "__main__":
    # Small, module-consistent shapes (windows/batch folded into channels; N=1).
    B = 2
    dim = 4
    k_size = 3
    stride = 1
    padding = 1
    ka_win_num = 3
    if_global = True
    G = B * (ka_win_num + 1) * dim     # = 32 groups == channels

    H = W = 8
    key = jax.random.PRNGKey(0)
    kx, kw = jax.random.split(key)
    x = jax.random.normal(kx, (1, G, H, W), dtype=jnp.float32)
    kernels = jax.random.normal(kw, (G, 1, k_size, k_size), dtype=jnp.float32)

    out = conv_layer_forward(
        x, kernels, B,
        dim=dim, k_size=k_size, stride=stride, padding=padding,
        ka_win_num=ka_win_num, if_global=if_global,
    )
    out = jax.block_until_ready(out)

    # Reference: grouped conv via lax (exact F.conv2d semantics).
    ref = jax.lax.conv_general_dilated(
        x, kernels,
        window_strides=(stride, stride),
        padding=((padding, padding), (padding, padding)),
        dimension_numbers=("NCHW", "OIHW", "NCHW"),
        feature_group_count=G,
    )
    assert out.shape == ref.shape == (1, G, H, W)
    assert jnp.allclose(out, ref, atol=1e-4, rtol=1e-4)

    print("KERNEL_OK")
</pallas_src>

<mosaic_0001>
module attributes {stable_mosaic.version = 11 : i64} {
  func.func @_depthwise_conv_kernel(%arg0: i32, %arg1: i32, %arg2: memref<1x8x8x128xf32, #tpu.memory_space<vmem>>, %arg3: memref<3x3x128xf32, #tpu.memory_space<vmem>>, %arg4: memref<1x8x8x128xf32, #tpu.memory_space<vmem>>, %arg5: memref<1x10x10x128xf32, #tpu.memory_space<vmem>>) attributes {dimension_semantics = [#tpu.dimension_semantics<parallel>, #tpu.dimension_semantics<parallel>], iteration_bounds = array<i64: 1, 1>, scalar_prefetch = 0 : i64, scratch_operands = 1 : i64, tpu.core_type = #tpu.core_type<tc>, window_params = [{transform_indices = @transform_0, window_bounds = array<i64: 1, 8, 8, 128>}, {transform_indices = @transform_1, window_bounds = array<i64: 3, 3, 128>}, {transform_indices = @transform_2, window_bounds = array<i64: 1, 8, 8, 128>}]} {
    %cst = arith.constant 0.000000e+00 : f32
    %0 = vector.broadcast %cst : f32 to vector<1x1x10x128xf32>
    %c0 = arith.constant 0 : index
    %c0_0 = arith.constant 0 : index
    %c0_1 = arith.constant 0 : index
    %c0_2 = arith.constant 0 : index
    %1 = vector.load %arg5[%c0, %c0_0, %c0_1, %c0_2] : memref<1x10x10x128xf32, #tpu.memory_space<vmem>>, vector<1x1x10x128xf32>
    tpu.vector_store %arg5[%c0, %c0_0, %c0_1, %c0_2], %0 {strides = array<i32>} : memref<1x10x10x128xf32, #tpu.memory_space<vmem>>, vector<1x1x10x128xf32>,
    %c0_3 = arith.constant 0 : index
    %c9 = arith.constant 9 : index
    %c0_4 = arith.constant 0 : index
    %c0_5 = arith.constant 0 : index
    %2 = vector.load %arg5[%c0_3, %c9, %c0_4, %c0_5] : memref<1x10x10x128xf32, #tpu.memory_space<vmem>>, vector<1x1x10x128xf32>
    tpu.vector_store %arg5[%c0_3, %c9, %c0_4, %c0_5], %0 {strides = array<i32>} : memref<1x10x10x128xf32, #tpu.memory_space<vmem>>, vector<1x1x10x128xf32>,
    %cst_6 = arith.constant 0.000000e+00 : f32
    %3 = vector.broadcast %cst_6 : f32 to vector<1x8x1x128xf32>
    %c0_7 = arith.constant 0 : index
    %c1 = arith.constant 1 : index
    %c0_8 = arith.constant 0 : index
    %c0_9 = arith.constant 0 : index
    %4 = vector.load %arg5[%c0_7, %c1, %c0_8, %c0_9] : memref<1x10x10x128xf32, #tpu.memory_space<vmem>>, vector<1x8x1x128xf32>
    tpu.vector_store %arg5[%c0_7, %c1, %c0_8, %c0_9], %3 {strides = array<i32>} : memref<1x10x10x128xf32, #tpu.memory_space<vmem>>, vector<1x8x1x128xf32>,
    %c0_10 = arith.constant 0 : index
    %c1_11 = arith.constant 1 : index
    %c9_12 = arith.constant 9 : index
    %c0_13 = arith.constant 0 : index
    %5 = vector.load %arg5[%c0_10, %c1_11, %c9_12, %c0_13] : memref<1x10x10x128xf32, #tpu.memory_space<vmem>>, vector<1x8x1x128xf32>
    tpu.vector_store %arg5[%c0_10, %c1_11, %c9_12, %c0_13], %3 {strides = array<i32>} : memref<1x10x10x128xf32, #tpu.memory_space<vmem>>, vector<1x8x1x128xf32>,
    %c0_14 = arith.constant 0 : index
    %c0_15 = arith.constant 0 : index
    %c0_16 = arith.constant 0 : index
    %c0_17 = arith.constant 0 : index
    %6 = vector.load %arg2[%c0_14, %c0_15, %c0_16, %c0_17] : memref<1x8x8x128xf32, #tpu.memory_space<vmem>>, vector<1x8x8x128xf32>
    %c0_18 = arith.constant 0 : index
    %c1_19 = arith.constant 1 : index
    %c1_20 = arith.constant 1 : index
    %c0_21 = arith.constant 0 : index
    %7 = vector.load %arg5[%c0_18, %c1_19, %c1_20, %c0_21] : memref<1x10x10x128xf32, #tpu.memory_space<vmem>>, vector<1x8x8x128xf32>
    tpu.vector_store %arg5[%c0_18, %c1_19, %c1_20, %c0_21], %6 {strides = array<i32>} : memref<1x10x10x128xf32, #tpu.memory_space<vmem>>, vector<1x8x8x128xf32>,
    %c0_22 = arith.constant 0 : index
    %c0_23 = arith.constant 0 : index
    %c0_24 = arith.constant 0 : index
    %8 = vector.load %arg3[%c0_22, %c0_23, %c0_24] : memref<3x3x128xf32, #tpu.memory_space<vmem>>, vector<3x3x128xf32>
    %9 = vector.extract_strided_slice %8 {offsets = [0, 0, 0], sizes = [1, 1, 128], strides = [1, 1, 1]} : vector<3x3x128xf32> to vector<1x1x128xf32>
    %10 = vector.shape_cast %9 : vector<1x1x128xf32> to vector<128xf32>
    %11 = vector.extract_strided_slice %8 {offsets = [0, 1, 0], sizes = [1, 1, 128], strides = [1, 1, 1]} : vector<3x3x128xf32> to vector<1x1x128xf32>
    %12 = vector.shape_cast %11 : vector<1x1x128xf32> to vector<128xf32>
    %13 = vector.extract_strided_slice %8 {offsets = [0, 2, 0], sizes = [1, 1, 128], strides = [1, 1, 1]} : vector<3x3x128xf32> to vector<1x1x128xf32>
    %14 = vector.shape_cast %13 : vector<1x1x128xf32> to vector<128xf32>
    %15 = vector.extract_strided_slice %8 {offsets = [1, 0, 0], sizes = [1, 1, 128], strides = [1, 1, 1]} : vector<3x3x128xf32> to vector<1x1x128xf32>
    %16 = vector.shape_cast %15 : vector<1x1x128xf32> to vector<128xf32>
    %17 = vector.extract_strided_slice %8 {offsets = [1, 1, 0], sizes = [1, 1, 128], strides = [1, 1, 1]} : vector<3x3x128xf32> to vector<1x1x128xf32>
    %18 = vector.shape_cast %17 : vector<1x1x128xf32> to vector<128xf32>
    %19 = vector.extract_strided_slice %8 {offsets = [1, 2, 0], sizes = [1, 1, 128], strides = [1, 1, 1]} : vector<3x3x128xf32> to vector<1x1x128xf32>
    %20 = vector.shape_cast %19 : vector<1x1x128xf32> to vector<128xf32>
    %21 = vector.extract_strided_slice %8 {offsets = [2, 0, 0], sizes = [1, 1, 128], strides = [1, 1, 1]} : vector<3x3x128xf32> to vector<1x1x128xf32>
    %22 = vector.shape_cast %21 : vector<1x1x128xf32> to vector<128xf32>
    %23 = vector.extract_strided_slice %8 {offsets = [2, 1, 0], sizes = [1, 1, 128], strides = [1, 1, 1]} : vector<3x3x128xf32> to vector<1x1x128xf32>
    %24 = vector.shape_cast %23 : vector<1x1x128xf32> to vector<128xf32>
    %25 = vector.extract_strided_slice %8 {offsets = [2, 2, 0], sizes = [1, 1, 128], strides = [1, 1, 1]} : vector<3x3x128xf32> to vector<1x1x128xf32>
    %26 = vector.shape_cast %25 : vector<1x1x128xf32> to vector<128xf32>
    %cst_25 = arith.constant 0.000000e+00 : f32
    %27 = vector.broadcast %cst_25 : f32 to vector<1x1x8x128xf32>
    %c0_26 = arith.constant 0 : index
    %c0_27 = arith.constant 0 : index
    %c0_28 = arith.constant 0 : index
    %c0_29 = arith.constant 0 : index
    %28 = vector.load %arg5[%c0_26, %c0_27, %c0_28, %c0_29] : memref<1x10x10x128xf32, #tpu.memory_space<vmem>>, vector<1x1x8x128xf32>
    %29 = vector.shape_cast %10 : vector<128xf32> to vector<1x1x1x128xf32>
    %30 = vector.broadcast %29 : vector<1x1x1x128xf32> to vector<1x1x8x128xf32>
    %31 = arith.mulf %28, %30 : vector<1x1x8x128xf32>
    %32 = arith.addf %27, %31 : vector<1x1x8x128xf32>
    %c0_30 = arith.constant 0 : index
    %c0_31 = arith.constant 0 : index
    %c1_32 = arith.constant 1 : index
    %c0_33 = arith.constant 0 : index
    %33 = vector.load %arg5[%c0_30, %c0_31, %c1_32, %c0_33] : memref<1x10x10x128xf32, #tpu.memory_space<vmem>>, vector<1x1x8x128xf32>
    %34 = vector.shape_cast %12 : vector<128xf32> to vector<1x1x1x128xf32>
    %35 = vector.broadcast %34 : vector<1x1x1x128xf32> to vector<1x1x8x128xf32>
    %36 = arith.mulf %33, %35 : vector<1x1x8x128xf32>
    %37 = arith.addf %32, %36 : vector<1x1x8x128xf32>
    %c0_34 = arith.constant 0 : index
    %c0_35 = arith.constant 0 : index
    %c2 = arith.constant 2 : index
    %c0_36 = arith.constant 0 : index
    %38 = vector.load %arg5[%c0_34, %c0_35, %c2, %c0_36] : memref<1x10x10x128xf32, #tpu.memory_space<vmem>>, vector<1x1x8x128xf32>
    %39 = vector.shape_cast %14 : vector<128xf32> to vector<1x1x1x128xf32>
    %40 = vector.broadcast %39 : vector<1x1x1x128xf32> to vector<1x1x8x128xf32>
    %41 = arith.mulf %38, %40 : vector<1x1x8x128xf32>
    %42 = arith.addf %37, %41 : vector<1x1x8x128xf32>
    %c0_37 = arith.constant 0 : index
    %c1_38 = arith.constant 1 : index
    %c0_39 = arith.constant 0 : index
    %c0_40 = arith.constant 0 : index
    %43 = vector.load %arg5[%c0_37, %c1_38, %c0_39, %c0_40] : memref<1x10x10x128xf32, #tpu.memory_space<vmem>>, vector<1x1x8x128xf32>
    %44 = vector.shape_cast %16 : vector<128xf32> to vector<1x1x1x128xf32>
    %45 = vector.broadcast %44 : vector<1x1x1x128xf32> to vector<1x1x8x128xf32>
    %46 = arith.mulf %43, %45 : vector<1x1x8x128xf32>
    %47 = arith.addf %42, %46 : vector<1x1x8x128xf32>
    %c0_41 = arith.constant 0 : index
    %c1_42 = arith.constant 1 : index
    %c1_43 = arith.constant 1 : index
    %c0_44 = arith.constant 0 : index
    %48 = vector.load %arg5[%c0_41, %c1_42, %c1_43, %c0_44] : memref<1x10x10x128xf32, #tpu.memory_space<vmem>>, vector<1x1x8x128xf32>
    %49 = vector.shape_cast %18 : vector<128xf32> to vector<1x1x1x128xf32>
    %50 = vector.broadcast %49 : vector<1x1x1x128xf32> to vector<1x1x8x128xf32>
    %51 = arith.mulf %48, %50 : vector<1x1x8x128xf32>
    %52 = arith.addf %47, %51 : vector<1x1x8x128xf32>
    %c0_45 = arith.constant 0 : index
    %c1_46 = arith.constant 1 : index
    %c2_47 = arith.constant 2 : index
    %c0_48 = arith.constant 0 : index
    %53 = vector.load %arg5[%c0_45, %c1_46, %c2_47, %c0_48] : memref<1x10x10x128xf32, #tpu.memory_space<vmem>>, vector<1x1x8x128xf32>
    %54 = vector.shape_cast %20 : vector<128xf32> to vector<1x1x1x128xf32>
    %55 = vector.broadcast %54 : vector<1x1x1x128xf32> to vector<1x1x8x128xf32>
    %56 = arith.mulf %53, %55 : vector<1x1x8x128xf32>
    %57 = arith.addf %52, %56 : vector<1x1x8x128xf32>
    %c0_49 = arith.constant 0 : index
    %c2_50 = arith.constant 2 : index
    %c0_51 = arith.constant 0 : index
    %c0_52 = arith.constant 0 : index
    %58 = vector.load %arg5[%c0_49, %c2_50, %c0_51, %c0_52] : memref<1x10x10x128xf32, #tpu.memory_space<vmem>>, vector<1x1x8x128xf32>
    %59 = vector.shape_cast %22 : vector<128xf32> to vector<1x1x1x128xf32>
    %60 = vector.broadcast %59 : vector<1x1x1x128xf32> to vector<1x1x8x128xf32>
    %61 = arith.mulf %58, %60 : vector<1x1x8x128xf32>
    %62 = arith.addf %57, %61 : vector<1x1x8x128xf32>
    %c0_53 = arith.constant 0 : index
    %c2_54 = arith.constant 2 : index
    %c1_55 = arith.constant 1 : index
    %c0_56 = arith.constant 0 : index
    %63 = vector.load %arg5[%c0_53, %c2_54, %c1_55, %c0_56] : memref<1x10x10x128xf32, #tpu.memory_space<vmem>>, vector<1x1x8x128xf32>
    %64 = vector.shape_cast %24 : vector<128xf32> to vector<1x1x1x128xf32>
    %65 = vector.broadcast %64 : vector<1x1x1x128xf32> to vector<1x1x8x128xf32>
    %66 = arith.mulf %63, %65 : vector<1x1x8x128xf32>
    %67 = arith.addf %62, %66 : vector<1x1x8x128xf32>
    %c0_57 = arith.constant 0 : index
    %c2_58 = arith.constant 2 : index
    %c2_59 = arith.constant 2 : index
    %c0_60 = arith.constant 0 : index
    %68 = vector.load %arg5[%c0_57, %c2_58, %c2_59, %c0_60] : memref<1x10x10x128xf32, #tpu.memory_space<vmem>>, vector<1x1x8x128xf32>
    %69 = vector.shape_cast %26 : vector<128xf32> to vector<1x1x1x128xf32>
    %70 = vector.broadcast %69 : vector<1x1x1x128xf32> to vector<1x1x8x128xf32>
    %71 = arith.mulf %68, %70 : vector<1x1x8x128xf32>
    %72 = arith.addf %67, %71 : vector<1x1x8x128xf32>
    %c0_61 = arith.constant 0 : index
    %c0_62 = arith.constant 0 : index
    %c0_63 = arith.constant 0 : index
    %c0_64 = arith.constant 0 : index
    %73 = vector.load %arg4[%c0_61, %c0_62, %c0_63, %c0_64] : memref<1x8x8x128xf32, #tpu.memory_space<vmem>>, vector<1x1x8x128xf32>
    tpu.vector_store %arg4[%c0_61, %c0_62, %c0_63, %c0_64], %72 {strides = array<i32>} : memref<1x8x8x128xf32, #tpu.memory_space<vmem>>, vector<1x1x8x128xf32>,
    %cst_65 = arith.constant 0.000000e+00 : f32
    %74 = vector.broadcast %cst_65 : f32 to vector<1x1x8x128xf32>
    %c0_66 = arith.constant 0 : index
    %c1_67 = arith.constant 1 : index
    %c0_68 = arith.constant 0 : index
    %c0_69 = arith.constant 0 : index
    %75 = vector.load %arg5[%c0_66, %c1_67, %c0_68, %c0_69] : memref<1x10x10x128xf32, #tpu.memory_space<vmem>>, vector<1x1x8x128xf32>
    %76 = vector.shape_cast %10 : vector<128xf32> to vector<1x1x1x128xf32>
    %77 = vector.broadcast %76 : vector<1x1x1x128xf32> to vector<1x1x8x128xf32>
    %78 = arith.mulf %75, %77 : vector<1x1x8x128xf32>
    %79 = arith.addf %74, %78 : vector<1x1x8x128xf32>
    %c0_70 = arith.constant 0 : index
    %c1_71 = arith.constant 1 : index
    %c1_72 = arith.constant 1 : index
    %c0_73 = arith.constant 0 : index
    %80 = vector.load %arg5[%c0_70, %c1_71, %c1_72, %c0_73] : memref<1x10x10x128xf32, #tpu.memory_space<vmem>>, vector<1x1x8x128xf32>
    %81 = vector.shape_cast %12 : vector<128xf32> to vector<1x1x1x128xf32>
    %82 = vector.broadcast %81 : vector<1x1x1x128xf32> to vector<1x1x8x128xf32>
    %83 = arith.mulf %80, %82 : vector<1x1x8x128xf32>
    %84 = arith.addf %79, %83 : vector<1x1x8x128xf32>
    %c0_74 = arith.constant 0 : index
    %c1_75 = arith.constant 1 : index
    %c2_76 = arith.constant 2 : index
    %c0_77 = arith.constant 0 : index
    %85 = vector.load %arg5[%c0_74, %c1_75, %c2_76, %c0_77] : memref<1x10x10x128xf32, #tpu.memory_space<vmem>>, vector<1x1x8x128xf32>
    %86 = vector.shape_cast %14 : vector<128xf32> to vector<1x1x1x128xf32>
    %87 = vector.broadcast %86 : vector<1x1x1x128xf32> to vector<1x1x8x128xf32>
    %88 = arith.mulf %85, %87 : vector<1x1x8x128xf32>
    %89 = arith.addf %84, %88 : vector<1x1x8x128xf32>
    %c0_78 = arith.constant 0 : index
    %c2_79 = arith.constant 2 : index
    %c0_80 = arith.constant 0 : index
    %c0_81 = arith.constant 0 : index
    %90 = vector.load %arg5[%c0_78, %c2_79, %c0_80, %c0_81] : memref<1x10x10x128xf32, #tpu.memory_space<vmem>>, vector<1x1x8x128xf32>
    %91 = vector.shape_cast %16 : vector<128xf32> to vector<1x1x1x128xf32>
    %92 = vector.broadcast %91 : vector<1x1x1x128xf32> to vector<1x1x8x128xf32>
    %93 = arith.mulf %90, %92 : vector<1x1x8x128xf32>
    %94 = arith.addf %89, %93 : vector<1x1x8x128xf32>
    %c0_82 = arith.constant 0 : index
    %c2_83 = arith.constant 2 : index
    %c1_84 = arith.constant 1 : index
    %c0_85 = arith.constant 0 : index
    %95 = vector.load %arg5[%c0_82, %c2_83, %c1_84, %c0_85] : memref<1x10x10x128xf32, #tpu.memory_space<vmem>>, vector<1x1x8x128xf32>
    %96 = vector.shape_cast %18 : vector<128xf32> to vector<1x1x1x128xf32>
    %97 = vector.broadcast %96 : vector<1x1x1x128xf32> to vector<1x1x8x128xf32>
    %98 = arith.mulf %95, %97 : vector<1x1x8x128xf32>
    %99 = arith.addf %94, %98 : vector<1x1x8x128xf32>
    %c0_86 = arith.constant 0 : index
    %c2_87 = arith.constant 2 : index
    %c2_88 = arith.constant 2 : index
    %c0_89 = arith.constant 0 : index
    %100 = vector.load %arg5[%c0_86, %c2_87, %c2_88, %c0_89] : memref<1x10x10x128xf32, #tpu.memory_space<vmem>>, vector<1x1x8x128xf32>
    %101 = vector.shape_cast %20 : vector<128xf32> to vector<1x1x1x128xf32>
    %102 = vector.broadcast %101 : vector<1x1x1x128xf32> to vector<1x1x8x128xf32>
    %103 = arith.mulf %100, %102 : vector<1x1x8x128xf32>
    %104 = arith.addf %99, %103 : vector<1x1x8x128xf32>
    %c0_90 = arith.constant 0 : index
    %c3 = arith.constant 3 : index
    %c0_91 = arith.constant 0 : index
    %c0_92 = arith.constant 0 : index
    %105 = vector.load %arg5[%c0_90, %c3, %c0_91, %c0_92] : memref<1x10x10x128xf32, #tpu.memory_space<vmem>>, vector<1x1x8x128xf32>
    %106 = vector.shape_cast %22 : vector<128xf32> to vector<1x1x1x128xf32>
    %107 = vector.broadcast %106 : vector<1x1x1x128xf32> to vector<1x1x8x128xf32>
    %108 = arith.mulf %105, %107 : vector<1x1x8x128xf32>
    %109 = arith.addf %104, %108 : vector<1x1x8x128xf32>
    %c0_93 = arith.constant 0 : index
    %c3_94 = arith.constant 3 : index
    %c1_95 = arith.constant 1 : index
    %c0_96 = arith.constant 0 : index
    %110 = vector.load %arg5[%c0_93, %c3_94, %c1_95, %c0_96] : memref<1x10x10x128xf32, #tpu.memory_space<vmem>>, vector<1x1x8x128xf32>
    %111 = vector.shape_cast %24 : vector<128xf32> to vector<1x1x1x128xf32>
    %112 = vector.broadcast %111 : vector<1x1x1x128xf32> to vector<1x1x8x128xf32>
    %113 = arith.mulf %110, %112 : vector<1x1x8x128xf32>
    %114 = arith.addf %109, %113 : vector<1x1x8x128xf32>
    %c0_97 = arith.constant 0 : index
    %c3_98 = arith.constant 3 : index
    %c2_99 = arith.constant 2 : index
    %c0_100 = arith.constant 0 : index
    %115 = vector.load %arg5[%c0_97, %c3_98, %c2_99, %c0_100] : memref<1x10x10x128xf32, #tpu.memory_space<vmem>>, vector<1x1x8x128xf32>
    %116 = vector.shape_cast %26 : vector<128xf32> to vector<1x1x1x128xf32>
    %117 = vector.broadcast %116 : vector<1x1x1x128xf32> to vector<1x1x8x128xf32>
    %118 = arith.mulf %115, %117 : vector<1x1x8x128xf32>
    %119 = arith.addf %114, %118 : vector<1x1x8x128xf32>
    %c0_101 = arith.constant 0 : index
    %c1_102 = arith.constant 1 : index
    %c0_103 = arith.constant 0 : index
    %c0_104 = arith.constant 0 : index
    %120 = vector.load %arg4[%c0_101, %c1_102, %c0_103, %c0_104] : memref<1x8x8x128xf32, #tpu.memory_space<vmem>>, vector<1x1x8x128xf32>
    tpu.vector_store %arg4[%c0_101, %c1_102, %c0_103, %c0_104], %119 {strides = array<i32>} : memref<1x8x8x128xf32, #tpu.memory_space<vmem>>, vector<1x1x8x128xf32>,
    %cst_105 = arith.constant 0.000000e+00 : f32
    %121 = vector.broadcast %cst_105 : f32 to vector<1x1x8x128xf32>
    %c0_106 = arith.constant 0 : index
    %c2_107 = arith.constant 2 : index
    %c0_108 = arith.constant 0 : index
    %c0_109 = arith.constant 0 : index
    %122 = vector.load %arg5[%c0_106, %c2_107, %c0_108, %c0_109] : memref<1x10x10x128xf32, #tpu.memory_space<vmem>>, vector<1x1x8x128xf32>
    %123 = vector.shape_cast %10 : vector<128xf32> to vector<1x1x1x128xf32>
    %124 = vector.broadcast %123 : vector<1x1x1x128xf32> to vector<1x1x8x128xf32>
    %125 = arith.mulf %122, %124 : vector<1x1x8x128xf32>
    %126 = arith.addf %121, %125 : vector<1x1x8x128xf32>
    %c0_110 = arith.constant 0 : index
    %c2_111 = arith.constant 2 : index
    %c1_112 = arith.constant 1 : index
    %c0_113 = arith.constant 0 : index
    %127 = vector.load %arg5[%c0_110, %c2_111, %c1_112, %c0_113] : memref<1x10x10x128xf32, #tpu.memory_space<vmem>>, vector<1x1x8x128xf32>
    %128 = vector.shape_cast %12 : vector<128xf32> to vector<1x1x1x128xf32>
    %129 = vector.broadcast %128 : vector<1x1x1x128xf32> to vector<1x1x8x128xf32>
    %130 = arith.mulf %127, %129 : vector<1x1x8x128xf32>
    %131 = arith.addf %126, %130 : vector<1x1x8x128xf32>
    %c0_114 = arith.constant 0 : index
    %c2_115 = arith.constant 2 : index
    %c2_116 = arith.constant 2 : index
    %c0_117 = arith.constant 0 : index
    %132 = vector.load %arg5[%c0_114, %c2_115, %c2_116, %c0_117] : memref<1x10x10x128xf32, #tpu.memory_space<vmem>>, vector<1x1x8x128xf32>
    %133 = vector.shape_cast %14 : vector<128xf32> to vector<1x1x1x128xf32>
    %134 = vector.broadcast %133 : vector<1x1x1x128xf32> to vector<1x1x8x128xf32>
    %135 = arith.mulf %132, %134 : vector<1x1x8x128xf32>
    %136 = arith.addf %131, %135 : vector<1x1x8x128xf32>
    %c0_118 = arith.constant 0 : index
    %c3_119 = arith.constant 3 : index
    %c0_120 = arith.constant 0 : index
    %c0_121 = arith.constant 0 : index
    %137 = vector.load %arg5[%c0_118, %c3_119, %c0_120, %c0_121] : memref<1x10x10x128xf32, #tpu.memory_space<vmem>>, vector<1x1x8x128xf32>
    %138 = vector.shape_cast %16 : vector<128xf32> to vector<1x1x1x128xf32>
    %139 = vector.broadcast %138 : vector<1x1x1x128xf32> to vector<1x1x8x128xf32>
    %140 = arith.mulf %137, %139 : vector<1x1x8x128xf32>
    %141 = arith.addf %136, %140 : vector<1x1x8x128xf32>
    %c0_122 = arith.constant 0 : index
    %c3_123 = arith.constant 3 : index
    %c1_124 = arith.constant 1 : index
    %c0_125 = arith.constant 0 : index
    %142 = vector.load %arg5[%c0_122, %c3_123, %c1_124, %c0_125] : memref<1x10x10x128xf32, #tpu.memory_space<vmem>>, vector<1x1x8x128xf32>
    %143 = vector.shape_cast %18 : vector<128xf32> to vector<1x1x1x128xf32>
    %144 = vector.broadcast %143 : vector<1x1x1x128xf32> to vector<1x1x8x128xf32>
    %145 = arith.mulf %142, %144 : vector<1x1x8x128xf32>
    %146 = arith.addf %141, %145 : vector<1x1x8x128xf32>
    %c0_126 = arith.constant 0 : index
    %c3_127 = arith.constant 3 : index
    %c2_128 = arith.constant 2 : index
    %c0_129 = arith.constant 0 : index
    %147 = vector.load %arg5[%c0_126, %c3_127, %c2_128, %c0_129] : memref<1x10x10x128xf32, #tpu.memory_space<vmem>>, vector<1x1x8x128xf32>
    %148 = vector.shape_cast %20 : vector<128xf32> to vector<1x1x1x128xf32>
    %149 = vector.broadcast %148 : vector<1x1x1x128xf32> to vector<1x1x8x128xf32>
    %150 = arith.mulf %147, %149 : vector<1x1x8x128xf32>
    %151 = arith.addf %146, %150 : vector<1x1x8x128xf32>
    %c0_130 = arith.constant 0 : index
    %c4 = arith.constant 4 : index
    %c0_131 = arith.constant 0 : index
    %c0_132 = arith.constant 0 : index
    %152 = vector.load %arg5[%c0_130, %c4, %c0_131, %c0_132] : memref<1x10x10x128xf32, #tpu.memory_space<vmem>>, vector<1x1x8x128xf32>
    %153 = vector.shape_cast %22 : vector<128xf32> to vector<1x1x1x128xf32>
    %154 = vector.broadcast %153 : vector<1x1x1x128xf32> to vector<1x1x8x128xf32>
    %155 = arith.mulf %152, %154 : vector<1x1x8x128xf32>
    %156 = arith.addf %151, %155 : vector<1x1x8x128xf32>
    %c0_133 = arith.constant 0 : index
    %c4_134 = arith.constant 4 : index
    %c1_135 = arith.constant 1 : index
    %c0_136 = arith.constant 0 : index
    %157 = vector.load %arg5[%c0_133, %c4_134, %c1_135, %c0_136] : memref<1x10x10x128xf32, #tpu.memory_space<vmem>>, vector<1x1x8x128xf32>
    %158 = vector.shape_cast %24 : vector<128xf32> to vector<1x1x1x128xf32>
    %159 = vector.broadcast %158 : vector<1x1x1x128xf32> to vector<1x1x8x128xf32>
    %160 = arith.mulf %157, %159 : vector<1x1x8x128xf32>
    %161 = arith.addf %156, %160 : vector<1x1x8x128xf32>
    %c0_137 = arith.constant 0 : index
    %c4_138 = arith.constant 4 : index
    %c2_139 = arith.constant 2 : index
    %c0_140 = arith.constant 0 : index
    %162 = vector.load %arg5[%c0_137, %c4_138, %c2_139, %c0_140] : memref<1x10x10x128xf32, #tpu.memory_space<vmem>>, vector<1x1x8x128xf32>
    %163 = vector.shape_cast %26 : vector<128xf32> to vector<1x1x1x128xf32>
    %164 = vector.broadcast %163 : vector<1x1x1x128xf32> to vector<1x1x8x128xf32>
    %165 = arith.mulf %162, %164 : vector<1x1x8x128xf32>
    %166 = arith.addf %161, %165 : vector<1x1x8x128xf32>
    %c0_141 = arith.constant 0 : index
    %c2_142 = arith.constant 2 : index
    %c0_143 = arith.constant 0 : index
    %c0_144 = arith.constant 0 : index
    %167 = vector.load %arg4[%c0_141, %c2_142, %c0_143, %c0_144] : memref<1x8x8x128xf32, #tpu.memory_space<vmem>>, vector<1x1x8x128xf32>
    tpu.vector_store %arg4[%c0_141, %c2_142, %c0_143, %c0_144], %166 {strides = array<i32>} : memref<1x8x8x128xf32, #tpu.memory_space<vmem>>, vector<1x1x8x128xf32>,
    %cst_145 = arith.constant 0.000000e+00 : f32
    %168 = vector.broadcast %cst_145 : f32 to vector<1x1x8x128xf32>
    %c0_146 = arith.constant 0 : index
    %c3_147 = arith.constant 3 : index
    %c0_148 = arith.constant 0 : index
    %c0_149 = arith.constant 0 : index
    %169 = vector.load %arg5[%c0_146, %c3_147, %c0_148, %c0_149] : memref<1x10x10x128xf32, #tpu.memory_space<vmem>>, vector<1x1x8x128xf32>
    %170 = vector.shape_cast %10 : vector<128xf32> to vector<1x1x1x128xf32>
    %171 = vector.broadcast %170 : vector<1x1x1x128xf32> to vector<1x1x8x128xf32>
    %172 = arith.mulf %169, %171 : vector<1x1x8x128xf32>
    %173 = arith.addf %168, %172 : vector<1x1x8x128xf32>
    %c0_150 = arith.constant 0 : index
    %c3_151 = arith.constant 3 : index
    %c1_152 = arith.constant 1 : index
    %c0_153 = arith.constant 0 : index
    %174 = vector.load %arg5[%c0_150, %c3_151, %c1_152, %c0_153] : memref<1x10x10x128xf32, #tpu.memory_space<vmem>>, vector<1x1x8x128xf32>
    %175 = vector.shape_cast %12 : vector<128xf32> to vector<1x1x1x128xf32>
    %176 = vector.broadcast %175 : vector<1x1x1x128xf32> to vector<1x1x8x128xf32>
    %177 = arith.mulf %174, %176 : vector<1x1x8x128xf32>
    %178 = arith.addf %173, %177 : vector<1x1x8x128xf32>
    %c0_154 = arith.constant 0 : index
    %c3_155 = arith.constant 3 : index
    %c2_156 = arith.constant 2 : index
    %c0_157 = arith.constant 0 : index
    %179 = vector.load %arg5[%c0_154, %c3_155, %c2_156, %c0_157] : memref<1x10x10x128xf32, #tpu.memory_space<vmem>>, vector<1x1x8x128xf32>
    %180 = vector.shape_cast %14 : vector<128xf32> to vector<1x1x1x128xf32>
    %181 = vector.broadcast %180 : vector<1x1x1x128xf32> to vector<1x1x8x128xf32>
    %182 = arith.mulf %179, %181 : vector<1x1x8x128xf32>
    %183 = arith.addf %178, %182 : vector<1x1x8x128xf32>
    %c0_158 = arith.constant 0 : index
    %c4_159 = arith.constant 4 : index
    %c0_160 = arith.constant 0 : index
    %c0_161 = arith.constant 0 : index
    %184 = vector.load %arg5[%c0_158, %c4_159, %c0_160, %c0_161] : memref<1x10x10x128xf32, #tpu.memory_space<vmem>>, vector<1x1x8x128xf32>
    %185 = vector.shape_cast %16 : vector<128xf32> to vector<1x1x1x128xf32>
    %186 = vector.broadcast %185 : vector<1x1x1x128xf32> to vector<1x1x8x128xf32>
    %187 = arith.mulf %184, %186 : vector<1x1x8x128xf32>
    %188 = arith.addf %183, %187 : vector<1x1x8x128xf32>
    %c0_162 = arith.constant 0 : index
    %c4_163 = arith.constant 4 : index
    %c1_164 = arith.constant 1 : index
    %c0_165 = arith.constant 0 : index
    %189 = vector.load %arg5[%c0_162, %c4_163, %c1_164, %c0_165] : memref<1x10x10x128xf32, #tpu.memory_space<vmem>>, vector<1x1x8x128xf32>
    %190 = vector.shape_cast %18 : vector<128xf32> to vector<1x1x1x128xf32>
    %191 = vector.broadcast %190 : vector<1x1x1x128xf32> to vector<1x1x8x128xf32>
    %192 = arith.mulf %189, %191 : vector<1x1x8x128xf32>
    %193 = arith.addf %188, %192 : vector<1x1x8x128xf32>
    %c0_166 = arith.constant 0 : index
    %c4_167 = arith.constant 4 : index
    %c2_168 = arith.constant 2 : index
    %c0_169 = arith.constant 0 : index
    %194 = vector.load %arg5[%c0_166, %c4_167, %c2_168, %c0_169] : memref<1x10x10x128xf32, #tpu.memory_space<vmem>>, vector<1x1x8x128xf32>
    %195 = vector.shape_cast %20 : vector<128xf32> to vector<1x1x1x128xf32>
    %196 = vector.broadcast %195 : vector<1x1x1x128xf32> to vector<1x1x8x128xf32>
    %197 = arith.mulf %194, %196 : vector<1x1x8x128xf32>
    %198 = arith.addf %193, %197 : vector<1x1x8x128xf32>
    %c0_170 = arith.constant 0 : index
    %c5 = arith.constant 5 : index
    %c0_171 = arith.constant 0 : index
    %c0_172 = arith.constant 0 : index
    %199 = vector.load %arg5[%c0_170, %c5, %c0_171, %c0_172] : memref<1x10x10x128xf32, #tpu.memory_space<vmem>>, vector<1x1x8x128xf32>
    %200 = vector.shape_cast %22 : vector<128xf32> to vector<1x1x1x128xf32>
    %201 = vector.broadcast %200 : vector<1x1x1x128xf32> to vector<1x1x8x128xf32>
    %202 = arith.mulf %199, %201 : vector<1x1x8x128xf32>
    %203 = arith.addf %198, %202 : vector<1x1x8x128xf32>
    %c0_173 = arith.constant 0 : index
    %c5_174 = arith.constant 5 : index
    %c1_175 = arith.constant 1 : index
    %c0_176 = arith.constant 0 : index
    %204 = vector.load %arg5[%c0_173, %c5_174, %c1_175, %c0_176] : memref<1x10x10x128xf32, #tpu.memory_space<vmem>>, vector<1x1x8x128xf32>
    %205 = vector.shape_cast %24 : vector<128xf32> to vector<1x1x1x128xf32>
    %206 = vector.broadcast %205 : vector<1x1x1x128xf32> to vector<1x1x8x128xf32>
    %207 = arith.mulf %204, %206 : vector<1x1x8x128xf32>
    %208 = arith.addf %203, %207 : vector<1x1x8x128xf32>
    %c0_177 = arith.constant 0 : index
    %c5_178 = arith.constant 5 : index
    %c2_179 = arith.constant 2 : index
    %c0_180 = arith.constant 0 : index
    %209 = vector.load %arg5[%c0_177, %c5_178, %c2_179, %c0_180] : memref<1x10x10x128xf32, #tpu.memory_space<vmem>>, vector<1x1x8x128xf32>
    %210 = vector.shape_cast %26 : vector<128xf32> to vector<1x1x1x128xf32>
    %211 = vector.broadcast %210 : vector<1x1x1x128xf32> to vector<1x1x8x128xf32>
    %212 = arith.mulf %209, %211 : vector<1x1x8x128xf32>
    %213 = arith.addf %208, %212 : vector<1x1x8x128xf32>
    %c0_181 = arith.constant 0 : index
    %c3_182 = arith.constant 3 : index
    %c0_183 = arith.constant 0 : index
    %c0_184 = arith.constant 0 : index
    %214 = vector.load %arg4[%c0_181, %c3_182, %c0_183, %c0_184] : memref<1x8x8x128xf32, #tpu.memory_space<vmem>>, vector<1x1x8x128xf32>
    tpu.vector_store %arg4[%c0_181, %c3_182, %c0_183, %c0_184], %213 {strides = array<i32>} : memref<1x8x8x128xf32, #tpu.memory_space<vmem>>, vector<1x1x8x128xf32>,
    %cst_185 = arith.constant 0.000000e+00 : f32
    %215 = vector.broadcast %cst_185 : f32 to vector<1x1x8x128xf32>
    %c0_186 = arith.constant 0 : index
    %c4_187 = arith.constant 4 : index
    %c0_188 = arith.constant 0 : index
    %c0_189 = arith.constant 0 : index
    %216 = vector.load %arg5[%c0_186, %c4_187, %c0_188, %c0_189] : memref<1x10x10x128xf32, #tpu.memory_space<vmem>>, vector<1x1x8x128xf32>
    %217 = vector.shape_cast %10 : vector<128xf32> to vector<1x1x1x128xf32>
    %218 = vector.broadcast %217 : vector<1x1x1x128xf32> to vector<1x1x8x128xf32>
    %219 = arith.mulf %216, %218 : vector<1x1x8x128xf32>
    %220 = arith.addf %215, %219 : vector<1x1x8x128xf32>
    %c0_190 = arith.constant 0 : index
    %c4_191 = arith.constant 4 : index
    %c1_192 = arith.constant 1 : index
    %c0_193 = arith.constant 0 : index
    %221 = vector.load %arg5[%c0_190, %c4_191, %c1_192, %c0_193] : memref<1x10x10x128xf32, #tpu.memory_space<vmem>>, vector<1x1x8x128xf32>
    %222 = vector.shape_cast %12 : vector<128xf32> to vector<1x1x1x128xf32>
    %223 = vector.broadcast %222 : vector<1x1x1x128xf32> to vector<1x1x8x128xf32>
    %224 = arith.mulf %221, %223 : vector<1x1x8x128xf32>
    %225 = arith.addf %220, %224 : vector<1x1x8x128xf32>
    %c0_194 = arith.constant 0 : index
    %c4_195 = arith.constant 4 : index
    %c2_196 = arith.constant 2 : index
    %c0_197 = arith.constant 0 : index
    %226 = vector.load %arg5[%c0_194, %c4_195, %c2_196, %c0_197] : memref<1x10x10x128xf32, #tpu.memory_space<vmem>>, vector<1x1x8x128xf32>
    %227 = vector.shape_cast %14 : vector<128xf32> to vector<1x1x1x128xf32>
    %228 = vector.broadcast %227 : vector<1x1x1x128xf32> to vector<1x1x8x128xf32>
    %229 = arith.mulf %226, %228 : vector<1x1x8x128xf32>
    %230 = arith.addf %225, %229 : vector<1x1x8x128xf32>
    %c0_198 = arith.constant 0 : index
    %c5_199 = arith.constant 5 : index
    %c0_200 = arith.constant 0 : index
    %c0_201 = arith.constant 0 : index
    %231 = vector.load %arg5[%c0_198, %c5_199, %c0_200, %c0_201] : memref<1x10x10x128xf32, #tpu.memory_space<vmem>>, vector<1x1x8x128xf32>
    %232 = vector.shape_cast %16 : vector<128xf32> to vector<1x1x1x128xf32>
    %233 = vector.broadcast %232 : vector<1x1x1x128xf32> to vector<1x1x8x128xf32>
    %234 = arith.mulf %231, %233 : vector<1x1x8x128xf32>
    %235 = arith.addf %230, %234 : vector<1x1x8x128xf32>
    %c0_202 = arith.constant 0 : index
    %c5_203 = arith.constant 5 : index
    %c1_204 = arith.constant 1 : index
    %c0_205 = arith.constant 0 : index
    %236 = vector.load %arg5[%c0_202, %c5_203, %c1_204, %c0_205] : memref<1x10x10x128xf32, #tpu.memory_space<vmem>>, vector<1x1x8x128xf32>
    %237 = vector.shape_cast %18 : vector<128xf32> to vector<1x1x1x128xf32>
    %238 = vector.broadcast %237 : vector<1x1x1x128xf32> to vector<1x1x8x128xf32>
    %239 = arith.mulf %236, %238 : vector<1x1x8x128xf32>
    %240 = arith.addf %235, %239 : vector<1x1x8x128xf32>
    %c0_206 = arith.constant 0 : index
    %c5_207 = arith.constant 5 : index
    %c2_208 = arith.constant 2 : index
    %c0_209 = arith.constant 0 : index
    %241 = vector.load %arg5[%c0_206, %c5_207, %c2_208, %c0_209] : memref<1x10x10x128xf32, #tpu.memory_space<vmem>>, vector<1x1x8x128xf32>
    %242 = vector.shape_cast %20 : vector<128xf32> to vector<1x1x1x128xf32>
    %243 = vector.broadcast %242 : vector<1x1x1x128xf32> to vector<1x1x8x128xf32>
    %244 = arith.mulf %241, %243 : vector<1x1x8x128xf32>
    %245 = arith.addf %240, %244 : vector<1x1x8x128xf32>
    %c0_210 = arith.constant 0 : index
    %c6 = arith.constant 6 : index
    %c0_211 = arith.constant 0 : index
    %c0_212 = arith.constant 0 : index
    %246 = vector.load %arg5[%c0_210, %c6, %c0_211, %c0_212] : memref<1x10x10x128xf32, #tpu.memory_space<vmem>>, vector<1x1x8x128xf32>
    %247 = vector.shape_cast %22 : vector<128xf32> to vector<1x1x1x128xf32>
    %248 = vector.broadcast %247 : vector<1x1x1x128xf32> to vector<1x1x8x128xf32>
    %249 = arith.mulf %246, %248 : vector<1x1x8x128xf32>
    %250 = arith.addf %245, %249 : vector<1x1x8x128xf32>
    %c0_213 = arith.constant 0 : index
    %c6_214 = arith.constant 6 : index
    %c1_215 = arith.constant 1 : index
    %c0_216 = arith.constant 0 : index
    %251 = vector.load %arg5[%c0_213, %c6_214, %c1_215, %c0_216] : memref<1x10x10x128xf32, #tpu.memory_space<vmem>>, vector<1x1x8x128xf32>
    %252 = vector.shape_cast %24 : vector<128xf32> to vector<1x1x1x128xf32>
    %253 = vector.broadcast %252 : vector<1x1x1x128xf32> to vector<1x1x8x128xf32>
    %254 = arith.mulf %251, %253 : vector<1x1x8x128xf32>
    %255 = arith.addf %250, %254 : vector<1x1x8x128xf32>
    %c0_217 = arith.constant 0 : index
    %c6_218 = arith.constant 6 : index
    %c2_219 = arith.constant 2 : index
    %c0_220 = arith.constant 0 : index
    %256 = vector.load %arg5[%c0_217, %c6_218, %c2_219, %c0_220] : memref<1x10x10x128xf32, #tpu.memory_space<vmem>>, vector<1x1x8x128xf32>
    %257 = vector.shape_cast %26 : vector<128xf32> to vector<1x1x1x128xf32>
    %258 = vector.broadcast %257 : vector<1x1x1x128xf32> to vector<1x1x8x128xf32>
    %259 = arith.mulf %256, %258 : vector<1x1x8x128xf32>
    %260 = arith.addf %255, %259 : vector<1x1x8x128xf32>
    %c0_221 = arith.constant 0 : index
    %c4_222 = arith.constant 4 : index
    %c0_223 = arith.constant 0 : index
    %c0_224 = arith.constant 0 : index
    %261 = vector.load %arg4[%c0_221, %c4_222, %c0_223, %c0_224] : memref<1x8x8x128xf32, #tpu.memory_space<vmem>>, vector<1x1x8x128xf32>
    tpu.vector_store %arg4[%c0_221, %c4_222, %c0_223, %c0_224], %260 {strides = array<i32>} : memref<1x8x8x128xf32, #tpu.memory_space<vmem>>, vector<1x1x8x128xf32>,
    %cst_225 = arith.constant 0.000000e+00 : f32
    %262 = vector.broadcast %cst_225 : f32 to vector<1x1x8x128xf32>
    %c0_226 = arith.constant 0 : index
    %c5_227 = arith.constant 5 : index
    %c0_228 = arith.constant 0 : index
    %c0_229 = arith.constant 0 : index
    %263 = vector.load %arg5[%c0_226, %c5_227, %c0_228, %c0_229] : memref<1x10x10x128xf32, #tpu.memory_space<vmem>>, vector<1x1x8x128xf32>
    %264 = vector.shape_cast %10 : vector<128xf32> to vector<1x1x1x128xf32>
    %265 = vector.broadcast %264 : vector<1x1x1x128xf32> to vector<1x1x8x128xf32>
    %266 = arith.mulf %263, %265 : vector<1x1x8x128xf32>
    %267 = arith.addf %262, %266 : vector<1x1x8x128xf32>
    %c0_230 = arith.constant 0 : index
    %c5_231 = arith.constant 5 : index
    %c1_232 = arith.constant 1 : index
    %c0_233 = arith.constant 0 : index
    %268 = vector.load %arg5[%c0_230, %c5_231, %c1_232, %c0_233] : memref<1x10x10x128xf32, #tpu.memory_space<vmem>>, vector<1x1x8x128xf32>
    %269 = vector.shape_cast %12 : vector<128xf32> to vector<1x1x1x128xf32>
    %270 = vector.broadcast %269 : vector<1x1x1x128xf32> to vector<1x1x8x128xf32>
    %271 = arith.mulf %268, %270 : vector<1x1x8x128xf32>
    %272 = arith.addf %267, %271 : vector<1x1x8x128xf32>
    %c0_234 = arith.constant 0 : index
    %c5_235 = arith.constant 5 : index
    %c2_236 = arith.constant 2 : index
    %c0_237 = arith.constant 0 : index
    %273 = vector.load %arg5[%c0_234, %c5_235, %c2_236, %c0_237] : memref<1x10x10x128xf32, #tpu.memory_space<vmem>>, vector<1x1x8x128xf32>
    %274 = vector.shape_cast %14 : vector<128xf32> to vector<1x1x1x128xf32>
    %275 = vector.broadcast %274 : vector<1x1x1x128xf32> to vector<1x1x8x128xf32>
    %276 = arith.mulf %273, %275 : vector<1x1x8x128xf32>
    %277 = arith.addf %272, %276 : vector<1x1x8x128xf32>
    %c0_238 = arith.constant 0 : index
    %c6_239 = arith.constant 6 : index
    %c0_240 = arith.constant 0 : index
    %c0_241 = arith.constant 0 : index
    %278 = vector.load %arg5[%c0_238, %c6_239, %c0_240, %c0_241] : memref<1x10x10x128xf32, #tpu.memory_space<vmem>>, vector<1x1x8x128xf32>
    %279 = vector.shape_cast %16 : vector<128xf32> to vector<1x1x1x128xf32>
    %280 = vector.broadcast %279 : vector<1x1x1x128xf32> to vector<1x1x8x128xf32>
    %281 = arith.mulf %278, %280 : vector<1x1x8x128xf32>
    %282 = arith.addf %277, %281 : vector<1x1x8x128xf32>
    %c0_242 = arith.constant 0 : index
    %c6_243 = arith.constant 6 : index
    %c1_244 = arith.constant 1 : index
    %c0_245 = arith.constant 0 : index
    %283 = vector.load %arg5[%c0_242, %c6_243, %c1_244, %c0_245] : memref<1x10x10x128xf32, #tpu.memory_space<vmem>>, vector<1x1x8x128xf32>
    %284 = vector.shape_cast %18 : vector<128xf32> to vector<1x1x1x128xf32>
    %285 = vector.broadcast %284 : vector<1x1x1x128xf32> to vector<1x1x8x128xf32>
    %286 = arith.mulf %283, %285 : vector<1x1x8x128xf32>
    %287 = arith.addf %282, %286 : vector<1x1x8x128xf32>
    %c0_246 = arith.constant 0 : index
    %c6_247 = arith.constant 6 : index
    %c2_248 = arith.constant 2 : index
    %c0_249 = arith.constant 0 : index
    %288 = vector.load %arg5[%c0_246, %c6_247, %c2_248, %c0_249] : memref<1x10x10x128xf32, #tpu.memory_space<vmem>>, vector<1x1x8x128xf32>
    %289 = vector.shape_cast %20 : vector<128xf32> to vector<1x1x1x128xf32>
    %290 = vector.broadcast %289 : vector<1x1x1x128xf32> to vector<1x1x8x128xf32>
    %291 = arith.mulf %288, %290 : vector<1x1x8x128xf32>
    %292 = arith.addf %287, %291 : vector<1x1x8x128xf32>
    %c0_250 = arith.constant 0 : index
    %c7 = arith.constant 7 : index
    %c0_251 = arith.constant 0 : index
    %c0_252 = arith.constant 0 : index
    %293 = vector.load %arg5[%c0_250, %c7, %c0_251, %c0_252] : memref<1x10x10x128xf32, #tpu.memory_space<vmem>>, vector<1x1x8x128xf32>
    %294 = vector.shape_cast %22 : vector<128xf32> to vector<1x1x1x128xf32>
    %295 = vector.broadcast %294 : vector<1x1x1x128xf32> to vector<1x1x8x128xf32>
    %296 = arith.mulf %293, %295 : vector<1x1x8x128xf32>
    %297 = arith.addf %292, %296 : vector<1x1x8x128xf32>
    %c0_253 = arith.constant 0 : index
    %c7_254 = arith.constant 7 : index
    %c1_255 = arith.constant 1 : index
    %c0_256 = arith.constant 0 : index
    %298 = vector.load %arg5[%c0_253, %c7_254, %c1_255, %c0_256] : memref<1x10x10x128xf32, #tpu.memory_space<vmem>>, vector<1x1x8x128xf32>
    %299 = vector.shape_cast %24 : vector<128xf32> to vector<1x1x1x128xf32>
    %300 = vector.broadcast %299 : vector<1x1x1x128xf32> to vector<1x1x8x128xf32>
    %301 = arith.mulf %298, %300 : vector<1x1x8x128xf32>
    %302 = arith.addf %297, %301 : vector<1x1x8x128xf32>
    %c0_257 = arith.constant 0 : index
    %c7_258 = arith.constant 7 : index
    %c2_259 = arith.constant 2 : index
    %c0_260 = arith.constant 0 : index
    %303 = vector.load %arg5[%c0_257, %c7_258, %c2_259, %c0_260] : memref<1x10x10x128xf32, #tpu.memory_space<vmem>>, vector<1x1x8x128xf32>
    %304 = vector.shape_cast %26 : vector<128xf32> to vector<1x1x1x128xf32>
    %305 = vector.broadcast %304 : vector<1x1x1x128xf32> to vector<1x1x8x128xf32>
    %306 = arith.mulf %303, %305 : vector<1x1x8x128xf32>
    %307 = arith.addf %302, %306 : vector<1x1x8x128xf32>
    %c0_261 = arith.constant 0 : index
    %c5_262 = arith.constant 5 : index
    %c0_263 = arith.constant 0 : index
    %c0_264 = arith.constant 0 : index
    %308 = vector.load %arg4[%c0_261, %c5_262, %c0_263, %c0_264] : memref<1x8x8x128xf32, #tpu.memory_space<vmem>>, vector<1x1x8x128xf32>
    tpu.vector_store %arg4[%c0_261, %c5_262, %c0_263, %c0_264], %307 {strides = array<i32>} : memref<1x8x8x128xf32, #tpu.memory_space<vmem>>, vector<1x1x8x128xf32>,
    %cst_265 = arith.constant 0.000000e+00 : f32
    %309 = vector.broadcast %cst_265 : f32 to vector<1x1x8x128xf32>
    %c0_266 = arith.constant 0 : index
    %c6_267 = arith.constant 6 : index
    %c0_268 = arith.constant 0 : index
    %c0_269 = arith.constant 0 : index
    %310 = vector.load %arg5[%c0_266, %c6_267, %c0_268, %c0_269] : memref<1x10x10x128xf32, #tpu.memory_space<vmem>>, vector<1x1x8x128xf32>
    %311 = vector.shape_cast %10 : vector<128xf32> to vector<1x1x1x128xf32>
    %312 = vector.broadcast %311 : vector<1x1x1x128xf32> to vector<1x1x8x128xf32>
    %313 = arith.mulf %310, %312 : vector<1x1x8x128xf32>
    %314 = arith.addf %309, %313 : vector<1x1x8x128xf32>
    %c0_270 = arith.constant 0 : index
    %c6_271 = arith.constant 6 : index
    %c1_272 = arith.constant 1 : index
    %c0_273 = arith.constant 0 : index
    %315 = vector.load %arg5[%c0_270, %c6_271, %c1_272, %c0_273] : memref<1x10x10x128xf32, #tpu.memory_space<vmem>>, vector<1x1x8x128xf32>
    %316 = vector.shape_cast %12 : vector<128xf32> to vector<1x1x1x128xf32>
    %317 = vector.broadcast %316 : vector<1x1x1x128xf32> to vector<1x1x8x128xf32>
    %318 = arith.mulf %315, %317 : vector<1x1x8x128xf32>
    %319 = arith.addf %314, %318 : vector<1x1x8x128xf32>
    %c0_274 = arith.constant 0 : index
    %c6_275 = arith.constant 6 : index
    %c2_276 = arith.constant 2 : index
    %c0_277 = arith.constant 0 : index
    %320 = vector.load %arg5[%c0_274, %c6_275, %c2_276, %c0_277] : memref<1x10x10x128xf32, #tpu.memory_space<vmem>>, vector<1x1x8x128xf32>
    %321 = vector.shape_cast %14 : vector<128xf32> to vector<1x1x1x128xf32>
    %322 = vector.broadcast %321 : vector<1x1x1x128xf32> to vector<1x1x8x128xf32>
    %323 = arith.mulf %320, %322 : vector<1x1x8x128xf32>
    %324 = arith.addf %319, %323 : vector<1x1x8x128xf32>
    %c0_278 = arith.constant 0 : index
    %c7_279 = arith.constant 7 : index
    %c0_280 = arith.constant 0 : index
    %c0_281 = arith.constant 0 : index
    %325 = vector.load %arg5[%c0_278, %c7_279, %c0_280, %c0_281] : memref<1x10x10x128xf32, #tpu.memory_space<vmem>>, vector<1x1x8x128xf32>
    %326 = vector.shape_cast %16 : vector<128xf32> to vector<1x1x1x128xf32>
    %327 = vector.broadcast %326 : vector<1x1x1x128xf32> to vector<1x1x8x128xf32>
    %328 = arith.mulf %325, %327 : vector<1x1x8x128xf32>
    %329 = arith.addf %324, %328 : vector<1x1x8x128xf32>
    %c0_282 = arith.constant 0 : index
    %c7_283 = arith.constant 7 : index
    %c1_284 = arith.constant 1 : index
    %c0_285 = arith.constant 0 : index
    %330 = vector.load %arg5[%c0_282, %c7_283, %c1_284, %c0_285] : memref<1x10x10x128xf32, #tpu.memory_space<vmem>>, vector<1x1x8x128xf32>
    %331 = vector.shape_cast %18 : vector<128xf32> to vector<1x1x1x128xf32>
    %332 = vector.broadcast %331 : vector<1x1x1x128xf32> to vector<1x1x8x128xf32>
    %333 = arith.mulf %330, %332 : vector<1x1x8x128xf32>
    %334 = arith.addf %329, %333 : vector<1x1x8x128xf32>
    %c0_286 = arith.constant 0 : index
    %c7_287 = arith.constant 7 : index
    %c2_288 = arith.constant 2 : index
    %c0_289 = arith.constant 0 : index
    %335 = vector.load %arg5[%c0_286, %c7_287, %c2_288, %c0_289] : memref<1x10x10x128xf32, #tpu.memory_space<vmem>>, vector<1x1x8x128xf32>
    %336 = vector.shape_cast %20 : vector<128xf32> to vector<1x1x1x128xf32>
    %337 = vector.broadcast %336 : vector<1x1x1x128xf32> to vector<1x1x8x128xf32>
    %338 = arith.mulf %335, %337 : vector<1x1x8x128xf32>
    %339 = arith.addf %334, %338 : vector<1x1x8x128xf32>
    %c0_290 = arith.constant 0 : index
    %c8 = arith.constant 8 : index
    %c0_291 = arith.constant 0 : index
    %c0_292 = arith.constant 0 : index
    %340 = vector.load %arg5[%c0_290, %c8, %c0_291, %c0_292] : memref<1x10x10x128xf32, #tpu.memory_space<vmem>>, vector<1x1x8x128xf32>
    %341 = vector.shape_cast %22 : vector<128xf32> to vector<1x1x1x128xf32>
    %342 = vector.broadcast %341 : vector<1x1x1x128xf32> to vector<1x1x8x128xf32>
    %343 = arith.mulf %340, %342 : vector<1x1x8x128xf32>
    %344 = arith.addf %339, %343 : vector<1x1x8x128xf32>
    %c0_293 = arith.constant 0 : index
    %c8_294 = arith.constant 8 : index
    %c1_295 = arith.constant 1 : index
    %c0_296 = arith.constant 0 : index
    %345 = vector.load %arg5[%c0_293, %c8_294, %c1_295, %c0_296] : memref<1x10x10x128xf32, #tpu.memory_space<vmem>>, vector<1x1x8x128xf32>
    %346 = vector.shape_cast %24 : vector<128xf32> to vector<1x1x1x128xf32>
    %347 = vector.broadcast %346 : vector<1x1x1x128xf32> to vector<1x1x8x128xf32>
    %348 = arith.mulf %345, %347 : vector<1x1x8x128xf32>
    %349 = arith.addf %344, %348 : vector<1x1x8x128xf32>
    %c0_297 = arith.constant 0 : index
    %c8_298 = arith.constant 8 : index
    %c2_299 = arith.constant 2 : index
    %c0_300 = arith.constant 0 : index
    %350 = vector.load %arg5[%c0_297, %c8_298, %c2_299, %c0_300] : memref<1x10x10x128xf32, #tpu.memory_space<vmem>>, vector<1x1x8x128xf32>
    %351 = vector.shape_cast %26 : vector<128xf32> to vector<1x1x1x128xf32>
    %352 = vector.broadcast %351 : vector<1x1x1x128xf32> to vector<1x1x8x128xf32>
    %353 = arith.mulf %350, %352 : vector<1x1x8x128xf32>
    %354 = arith.addf %349, %353 : vector<1x1x8x128xf32>
    %c0_301 = arith.constant 0 : index
    %c6_302 = arith.constant 6 : index
    %c0_303 = arith.constant 0 : index
    %c0_304 = arith.constant 0 : index
    %355 = vector.load %arg4[%c0_301, %c6_302, %c0_303, %c0_304] : memref<1x8x8x128xf32, #tpu.memory_space<vmem>>, vector<1x1x8x128xf32>
    tpu.vector_store %arg4[%c0_301, %c6_302, %c0_303, %c0_304], %354 {strides = array<i32>} : memref<1x8x8x128xf32, #tpu.memory_space<vmem>>, vector<1x1x8x128xf32>,
    %cst_305 = arith.constant 0.000000e+00 : f32
    %356 = vector.broadcast %cst_305 : f32 to vector<1x1x8x128xf32>
    %c0_306 = arith.constant 0 : index
    %c7_307 = arith.constant 7 : index
    %c0_308 = arith.constant 0 : index
    %c0_309 = arith.constant 0 : index
    %357 = vector.load %arg5[%c0_306, %c7_307, %c0_308, %c0_309] : memref<1x10x10x128xf32, #tpu.memory_space<vmem>>, vector<1x1x8x128xf32>
    %358 = vector.shape_cast %10 : vector<128xf32> to vector<1x1x1x128xf32>
    %359 = vector.broadcast %358 : vector<1x1x1x128xf32> to vector<1x1x8x128xf32>
    %360 = arith.mulf %357, %359 : vector<1x1x8x128xf32>
    %361 = arith.addf %356, %360 : vector<1x1x8x128xf32>
    %c0_310 = arith.constant 0 : index
    %c7_311 = arith.constant 7 : index
    %c1_312 = arith.constant 1 : index
    %c0_313 = arith.constant 0 : index
    %362 = vector.load %arg5[%c0_310, %c7_311, %c1_312, %c0_313] : memref<1x10x10x128xf32, #tpu.memory_space<vmem>>, vector<1x1x8x128xf32>
    %363 = vector.shape_cast %12 : vector<128xf32> to vector<1x1x1x128xf32>
    %364 = vector.broadcast %363 : vector<1x1x1x128xf32> to vector<1x1x8x128xf32>
    %365 = arith.mulf %362, %364 : vector<1x1x8x128xf32>
    %366 = arith.addf %361, %365 : vector<1x1x8x128xf32>
    %c0_314 = arith.constant 0 : index
    %c7_315 = arith.constant 7 : index
    %c2_316 = arith.constant 2 : index
    %c0_317 = arith.constant 0 : index
    %367 = vector.load %arg5[%c0_314, %c7_315, %c2_316, %c0_317] : memref<1x10x10x128xf32, #tpu.memory_space<vmem>>, vector<1x1x8x128xf32>
    %368 = vector.shape_cast %14 : vector<128xf32> to vector<1x1x1x128xf32>
    %369 = vector.broadcast %368 : vector<1x1x1x128xf32> to vector<1x1x8x128xf32>
    %370 = arith.mulf %367, %369 : vector<1x1x8x128xf32>
    %371 = arith.addf %366, %370 : vector<1x1x8x128xf32>
    %c0_318 = arith.constant 0 : index
    %c8_319 = arith.constant 8 : index
    %c0_320 = arith.constant 0 : index
    %c0_321 = arith.constant 0 : index
    %372 = vector.load %arg5[%c0_318, %c8_319, %c0_320, %c0_321] : memref<1x10x10x128xf32, #tpu.memory_space<vmem>>, vector<1x1x8x128xf32>
    %373 = vector.shape_cast %16 : vector<128xf32> to vector<1x1x1x128xf32>
    %374 = vector.broadcast %373 : vector<1x1x1x128xf32> to vector<1x1x8x128xf32>
    %375 = arith.mulf %372, %374 : vector<1x1x8x128xf32>
    %376 = arith.addf %371, %375 : vector<1x1x8x128xf32>
    %c0_322 = arith.constant 0 : index
    %c8_323 = arith.constant 8 : index
    %c1_324 = arith.constant 1 : index
    %c0_325 = arith.constant 0 : index
    %377 = vector.load %arg5[%c0_322, %c8_323, %c1_324, %c0_325] : memref<1x10x10x128xf32, #tpu.memory_space<vmem>>, vector<1x1x8x128xf32>
    %378 = vector.shape_cast %18 : vector<128xf32> to vector<1x1x1x128xf32>
    %379 = vector.broadcast %378 : vector<1x1x1x128xf32> to vector<1x1x8x128xf32>
    %380 = arith.mulf %377, %379 : vector<1x1x8x128xf32>
    %381 = arith.addf %376, %380 : vector<1x1x8x128xf32>
    %c0_326 = arith.constant 0 : index
    %c8_327 = arith.constant 8 : index
    %c2_328 = arith.constant 2 : index
    %c0_329 = arith.constant 0 : index
    %382 = vector.load %arg5[%c0_326, %c8_327, %c2_328, %c0_329] : memref<1x10x10x128xf32, #tpu.memory_space<vmem>>, vector<1x1x8x128xf32>
    %383 = vector.shape_cast %20 : vector<128xf32> to vector<1x1x1x128xf32>
    %384 = vector.broadcast %383 : vector<1x1x1x128xf32> to vector<1x1x8x128xf32>
    %385 = arith.mulf %382, %384 : vector<1x1x8x128xf32>
    %386 = arith.addf %381, %385 : vector<1x1x8x128xf32>
    %c0_330 = arith.constant 0 : index
    %c9_331 = arith.constant 9 : index
    %c0_332 = arith.constant 0 : index
    %c0_333 = arith.constant 0 : index
    %387 = vector.load %arg5[%c0_330, %c9_331, %c0_332, %c0_333] : memref<1x10x10x128xf32, #tpu.memory_space<vmem>>, vector<1x1x8x128xf32>
    %388 = vector.shape_cast %22 : vector<128xf32> to vector<1x1x1x128xf32>
    %389 = vector.broadcast %388 : vector<1x1x1x128xf32> to vector<1x1x8x128xf32>
    %390 = arith.mulf %387, %389 : vector<1x1x8x128xf32>
    %391 = arith.addf %386, %390 : vector<1x1x8x128xf32>
    %c0_334 = arith.constant 0 : index
    %c9_335 = arith.constant 9 : index
    %c1_336 = arith.constant 1 : index
    %c0_337 = arith.constant 0 : index
    %392 = vector.load %arg5[%c0_334, %c9_335, %c1_336, %c0_337] : memref<1x10x10x128xf32, #tpu.memory_space<vmem>>, vector<1x1x8x128xf32>
    %393 = vector.shape_cast %24 : vector<128xf32> to vector<1x1x1x128xf32>
    %394 = vector.broadcast %393 : vector<1x1x1x128xf32> to vector<1x1x8x128xf32>
    %395 = arith.mulf %392, %394 : vector<1x1x8x128xf32>
    %396 = arith.addf %391, %395 : vector<1x1x8x128xf32>
    %c0_338 = arith.constant 0 : index
    %c9_339 = arith.constant 9 : index
    %c2_340 = arith.constant 2 : index
    %c0_341 = arith.constant 0 : index
    %397 = vector.load %arg5[%c0_338, %c9_339, %c2_340, %c0_341] : memref<1x10x10x128xf32, #tpu.memory_space<vmem>>, vector<1x1x8x128xf32>
    %398 = vector.shape_cast %26 : vector<128xf32> to vector<1x1x1x128xf32>
    %399 = vector.broadcast %398 : vector<1x1x1x128xf32> to vector<1x1x8x128xf32>
    %400 = arith.mulf %397, %399 : vector<1x1x8x128xf32>
    %401 = arith.addf %396, %400 : vector<1x1x8x128xf32>
    %c0_342 = arith.constant 0 : index
    %c7_343 = arith.constant 7 : index
    %c0_344 = arith.constant 0 : index
    %c0_345 = arith.constant 0 : index
    %402 = vector.load %arg4[%c0_342, %c7_343, %c0_344, %c0_345] : memref<1x8x8x128xf32, #tpu.memory_space<vmem>>, vector<1x1x8x128xf32>
    tpu.vector_store %arg4[%c0_342, %c7_343, %c0_344, %c0_345], %401 {strides = array<i32>} : memref<1x8x8x128xf32, #tpu.memory_space<vmem>>, vector<1x1x8x128xf32>,
    return
  }
  func.func @transform_0(%arg0: i32, %arg1: i32) -> (i32, i32, i32, i32) {
    %c0_i32 = arith.constant 0 : i32
    %c0_i32_0 = arith.constant 0 : i32
    %c0_i32_1 = arith.constant 0 : i32
    return %arg1, %c0_i32, %c0_i32_0, %arg0 : i32, i32, i32, i32
  }
  func.func @transform_1(%arg0: i32, %arg1: i32) -> (i32, i32, i32) {
    %c0_i32 = arith.constant 0 : i32
    %c0_i32_0 = arith.constant 0 : i32
    %c0_i32_1 = arith.constant 0 : i32
    return %c0_i32, %c0_i32_0, %arg0 : i32, i32, i32
  }
  func.func @transform_2(%arg0: i32, %arg1: i32) -> (i32, i32, i32, i32) {
    %c0_i32 = arith.constant 0 : i32
    %c0_i32_0 = arith.constant 0 : i32
    %c0_i32_1 = arith.constant 0 : i32
    return %arg1, %c0_i32, %c0_i32_0, %arg0 : i32, i32, i32, i32
  }
}

</mosaic_0001>

<bundles_post_ra>
// kernel: tpu_custom_call.1
= control target key start
LH: loop header
LB: loop body
LE: loop exit
PB: predicated region body
PF: predicated region fallthrough
CT: control target
= control target key end

     0   :  { %7 = vsyncpa [#allocation4], 0  ;;  %s610_s0 = inlined_call_operand.hbm [shape: f32[1,8,8,128], index: 0, kind: input, shape index: {}]   ;;  %s611_s1 = inlined_call_operand.hbm [shape: f32[3,3,128], index: 1, kind: input, shape index: {}]   ;;  %s612_s2 = inlined_call_operand.hbm [shape: f32[1,8,8,128], index: 2, kind: output, shape index: {}]  }
   0x1   :  { %8 = vsyncpa [#allocation7], 0 }
   0x2   :  { %9 = vsyncpa [#allocation5], 0  ;;  %s447_s9 = smov [#allocation3]  }
   0x3   :  { %s15_s10 = sshll.u32 %s447_s9, 4  ;;  %s16_s10 = int_to_ptr.vmem [resolvable:$true] %s15_s10 }
   0x4   :  { %s389_s11 = scalar_lea.vmem %s16_s10, 1024  ;;  %p394_p1 = scmp.lt.s32.totalorder %s16_s10, %s16_s10 }
   0x5   :  { %p390_p0 = scmp.ne.s32.totalorder %s16_s10, %s389_s11  ;;  %p395_p2 = scmp.lt.s32.totalorder %s389_s11, %s389_s11 }
   0x7   :  { %p396_p3 = por %p395_p2, %p394_p1 }
   0x9   :  { %p397_p4 = pnand %p396_p3, %p390_p0 }
   0xb   :  { %400 = shalt.err (!%p397_p4)
}
   0xc   :  { %s448_s12 = smov 128   ;;  %s449_s13 = smov 8  }
   0xd   :  { %21 = dma.hbm_to_vmem [thread:$0]  %s610_s0, 1024, %s16_s10, [#allocation4], %s448_s12, %s448_s12, %s449_s13  }
   0xe   :  { %s450_s16 = smov [#allocation6]  }
   0xf   :  { %s27_s17 = sshll.u32 %s450_s16, 4  ;;  %s28_s17 = int_to_ptr.vmem [resolvable:$true] %s27_s17 }
  0x10   :  { %s409_s18 = scalar_lea.vmem %s28_s17, 192  ;;  %p414_p6 = scmp.lt.s32.totalorder %s28_s17, %s28_s17 }
  0x11   :  { %p410_p5 = scmp.ne.s32.totalorder %s28_s17, %s409_s18  ;;  %p415_p7 = scmp.lt.s32.totalorder %s409_s18, %s409_s18 }
  0x13   :  { %p416_p8 = por %p415_p7, %p414_p6 }
  0x15   :  { %p417_p9 = pnand %p416_p8, %p410_p5 }
  0x17   :  { %420 = shalt.err (!%p417_p9)
}
  0x18   :  { %s451_s19 = smov 64   ;;  %s452_s20 = smov 4  }
  0x19   :  { %33 = dma.hbm_to_vmem [thread:$0]  %s611_s1, 192, %s28_s17, [#allocation7], %s451_s19, %s451_s19, %s452_s20  }
  0x1a   :  { %441 = dma.done.wait [#allocation4], 1024  }
  0x1b   :  { %442 = vsyncadd [#allocation4], 4294966272 }
  0x1c   :  { %443 = dma.done.wait [#allocation7], 192  }
  0x1d   :  { %444 = vsyncadd [#allocation7], 4294967104  ;;  %v82_v0 = vlaneseq  ;;  %v453_v1 = vmov 0.0   ;;  %v62_v6 = vld [vmem:[#allocation3] sm:$0xff]  ;;  %v63_v7 = vld [vmem:[#allocation3 + $0x8] sm:$0xff]  ;;  %s454_s0 = smov [#allocation8]  }
  0x1e   :  { %40 = vst [vmem:[#allocation2] sm:$0xff] %v453_v1  ;;  %41 = vst [vmem:[#allocation2 + $0x8] sm:$0x3] %v453_v1  ;;  %v64_v8 = vld [vmem:[#allocation3 + $0x10] sm:$0xff]  ;;  %v479_v9 = vld [vmem:[#allocation3 + $0x18] sm:$0xff]  ;;  %s360_s1 = sshll.u32 %s454_s0, 4  ;;  %s361_s1 = int_to_ptr.vmem [resolvable:$true] %s360_s1 }
  0x1f   :  { %43 = vst [vmem:[#allocation2 + $0x90] sm:$0xff] %v453_v1  ;;  %44 = vst [vmem:[#allocation2 + $0x98] sm:$0x3] %v453_v1  ;;  %v83_v2 = vshrl.u32 %v82_v0, 7  ;;  %v481_v10 = vld [vmem:[#allocation3 + $0x20] sm:$0xff]  ;;  %v483_v11 = vld [vmem:[#allocation3 + $0x28] sm:$0xff]  ;;  %p426_p11 = scmp.lt.s32.totalorder %s361_s1, %s361_s1 }
  0x20   :  { %46 = vst [vmem:[#allocation2 + $0x10] sm:$0x1] %v453_v1  ;;  %47 = vst [vmem:[#allocation2 + $0x20] sm:$0x1] %v453_v1  ;;  %v488_v12 = vld [vmem:[#allocation3 + $0x30] sm:$0xff]  ;;  %v490_v13 = vld [vmem:[#allocation3 + $0x38] sm:$0xff] }
  0x21   :  { %48 = vst [vmem:[#allocation2 + $0x30] sm:$0x1] %v453_v1  ;;  %49 = vst [vmem:[#allocation2 + $0x40] sm:$0x1] %v453_v1  ;;  %v84_v3 = vsub.s32 0, %v83_v2  ;;  %v91_v4 = vsub.s32 1, %v83_v2 }
  0x22   :  { %50 = vst [vmem:[#allocation2 + $0x50] sm:$0x1] %v453_v1  ;;  %51 = vst [vmem:[#allocation2 + $0x60] sm:$0x1] %v453_v1  ;;  %v98_v5 = vsub.s32 2, %v83_v2  ;;  %s421_s23 = scalar_lea.vmem %s361_s1, 1024 }
  0x23   :  { %52 = vst [vmem:[#allocation2 + $0x70] sm:$0x1] %v453_v1  ;;  %53 = vst [vmem:[#allocation2 + $0x80] sm:$0x1] %v453_v1  ;;  %v78_v14 = vld [vmem:[#allocation6] sm:$0x7]  ;;  %p422_p10 = scmp.ne.s32.totalorder %s361_s1, %s421_s23  ;;  %p427_p12 = scmp.lt.s32.totalorder %s421_s23, %s421_s23 }
  0x24   :  { %54 = vst [vmem:[#allocation2 + $0x19] sm:$0x1] %v453_v1  ;;  %55 = vst [vmem:[#allocation2 + $0x29] sm:$0x1] %v453_v1  ;;  %v79_v15 = vld [vmem:[#allocation6 + $0x4] sm:$0x7]  ;;  %v494_v16 = vrot.slane %v78_v14, %v84_v3  ;;  %v496_v18 = vrot.slane %v78_v14, %v91_v4  ;;  %v498_v19 = vrot.slane %v78_v14, %v98_v5 }
  0x25   :  { %56 = vst [vmem:[#allocation2 + $0x39] sm:$0x1] %v453_v1  ;;  %57 = vst [vmem:[#allocation2 + $0x49] sm:$0x1] %v453_v1  ;;  %v88_v17 = vld [vmem:[#allocation2 + $0x1] sm:$0xff]  ;;  %v500_v22 = vrot.slane %v79_v15, %v84_v3  ;;  %v502_v23 = vrot.slane %v79_v15, %v91_v4  ;;  %v509_v28 = vrot.slane %v79_v15, %v98_v5  ;;  %p428_p13 = por %p427_p12, %p426_p11 }
  0x26   :  { %58 = vst [vmem:[#allocation2 + $0x59] sm:$0x1] %v453_v1  ;;  %59 = vst [vmem:[#allocation2 + $0x69] sm:$0x1] %v453_v1  ;;  %v80_v20 = vld [vmem:[#allocation6 + $0x8] sm:$0x7]  ;;  %v93_v25 = vmul.f32 %v496_v18, %v88_v17  ;;  %v150_v37 = vmul.f32 %v496_v18, %v62_v6  ;;  %v180_v43 = vmul.f32 %v496_v18, %v63_v7 }
  0x27   :  { %60 = vst [vmem:[#allocation2 + $0x79] sm:$0x1] %v453_v1  ;;  %61 = vst [vmem:[#allocation2 + $0x89] sm:$0x1] %v453_v1  ;;  %v95_v21 = vld [vmem:[#allocation2 + $0x2] sm:$0xff]  ;;  %v86_v24 = vmul.f32 0.0, %v494_v16  ;;  %v507_v27 = vrot.slane %v80_v20, %v91_v4  ;;  %v114_v30 = vmul.f32 %v502_v23, %v62_v6  ;;  %v512_v31 = vrot.slane %v80_v20, %v84_v3  ;;  %p429_p0 = pnand %p428_p13, %p422_p10 }
  0x28   :  { %70 = vst [vmem:[#allocation2 + $0x11] sm:$0xff] %v62_v6  ;;  %71 = vst [vmem:[#allocation2 + $0x21] sm:$0xff] %v63_v7  ;;  %v100_v26 = vmul.f32 %v498_v19, %v95_v21  ;;  %v514_v32 = vrot.slane %v80_v20, %v98_v5  ;;  %v159_v38 = vmul.f32 %v502_v23, %v63_v7 }
  0x29   :  { %72 = vst [vmem:[#allocation2 + $0x31] sm:$0xff] %v64_v8  ;;  %73 = vst [vmem:[#allocation2 + $0x41] sm:$0xff] %v479_v9  ;;  %v94_v29 = vadd.f32 %v93_v25, %v86_v24  ;;  %v136_v36 = vmul.f32 %v507_v27, %v63_v7  ;;  %v520_v39 = vmul.f32 %v507_v27, %v64_v8 }
  0x2a   :  { %74 = vst [vmem:[#allocation2 + $0x51] sm:$0xff] %v481_v10  ;;  %75 = vst [vmem:[#allocation2 + $0x61] sm:$0xff] %v483_v11  ;;  %v189_v44 = vmul.f32 %v502_v23, %v64_v8  ;;  %v528_v48 = vmul.f32 %v507_v27, %v479_v9  ;;  %v210_v49 = vmul.f32 %v496_v18, %v64_v8 }
  0x2b   :  { %76 = vst [vmem:[#allocation2 + $0x71] sm:$0xff] %v488_v12  ;;  %77 = vst [vmem:[#allocation2 + $0x81] sm:$0xff] %v490_v13  ;;  %v101_v40 = vadd.f32 %v100_v26, %v94_v29  ;;  %v219_v50 = vmul.f32 %v502_v23, %v479_v9  ;;  %v240_v29 = vmul.f32 %v496_v18, %v479_v9 }
  0x2f   :  { %v102_v33 = vld [vmem:[#allocation2 + $0x10] sm:$0xff]  ;;  %v124_v35 = vld [vmem:[#allocation2 + $0x20] sm:$0xff] }
  0x30   :  { %v116_v34 = vld [vmem:[#allocation2 + $0x12] sm:$0xff]  ;;  %v107_v41 = vmul.f32 %v500_v22, %v102_v33  ;;  %v138_v42 = vld [vmem:[#allocation2 + $0x22] sm:$0xff]  ;;  %v147_v45 = vmul.f32 %v102_v33, %v494_v16  ;;  %v129_v53 = vmul.f32 %v512_v31, %v124_v35  ;;  %v156_v57 = vmul.f32 %v124_v35, %v500_v22 }
  0x31   :  { %v165_v46 = vld [vmem:[#allocation2 + $0x30] sm:$0xff]  ;;  %v121_v52 = vmul.f32 %v509_v28, %v116_v34  ;;  %v143_v54 = vmul.f32 %v514_v32, %v138_v42  ;;  %v153_v56 = vmul.f32 %v116_v34, %v498_v19  ;;  %v177_v58 = vmul.f32 %v124_v35, %v494_v16  ;;  %v195_v59 = vld [vmem:[#allocation2 + $0x40] sm:$0xff] }
  0x32   :  { %v171_v47 = vld [vmem:[#allocation2 + $0x32] sm:$0xff]  ;;  %v108_v51 = vadd.f32 %v107_v41, %v101_v40  ;;  %v151_v55 = vadd.f32 %v150_v37, %v147_v45  ;;  %v162_v61 = vmul.f32 %v138_v42, %v509_v28  ;;  %v166_v62 = vmul.f32 %v165_v46, %v512_v31  ;;  %v201_v3 = vld [vmem:[#allocation2 + $0x42] sm:$0xff] }
  0x33   :  { %v172_v63 = vmul.f32 %v171_v47, %v514_v32  ;;  %v181_v1 = vadd.f32 %v180_v43, %v177_v58  ;;  %v183_v2 = vmul.f32 %v138_v42, %v498_v19  ;;  %v207_v4 = vmul.f32 %v165_v46, %v494_v16  ;;  %v225_v25 = vld [vmem:[#allocation2 + $0x50] sm:$0xff] }
  0x34   :  { %v115_v60 = vadd.f32 %v114_v30, %v108_v51  ;;  %v154_v0 = vadd.f32 %v153_v56, %v151_v55  ;;  %v186_v6 = vmul.f32 %v165_v46, %v500_v22  ;;  %v192_v7 = vmul.f32 %v171_v47, %v509_v28 }
  0x35   :  { %v196_v8 = vmul.f32 %v195_v59, %v512_v31  ;;  %v184_v15 = vadd.f32 %v183_v2, %v181_v1  ;;  %v211_v17 = vadd.f32 %v210_v49, %v207_v4  ;;  %v213_v20 = vmul.f32 %v171_v47, %v498_v19  ;;  %v231_v49 = vld [vmem:[#allocation2 + $0x52] sm:$0xff] }
  0x36   :  { %v122_v5 = vadd.f32 %v121_v52, %v115_v60  ;;  %v157_v14 = vadd.f32 %v156_v57, %v154_v0  ;;  %v202_v24 = vmul.f32 %v201_v3, %v514_v32  ;;  %v237_v26 = vmul.f32 %v195_v59, %v494_v16  ;;  %v255_v57 = vld [vmem:[#allocation2 + $0x60] sm:$0xff] }
  0x37   :  { %v187_v33 = vadd.f32 %v186_v6, %v184_v15  ;;  %v214_v34 = vadd.f32 %v213_v20, %v211_v17  ;;  %v216_v35 = vmul.f32 %v195_v59, %v500_v22  ;;  %v222_v40 = vmul.f32 %v201_v3, %v509_v28 }
  0x38   :  { %v130_v21 = vadd.f32 %v129_v53, %v122_v5  ;;  %v160_v30 = vadd.f32 %v159_v38, %v157_v14  ;;  %v241_v41 = vadd.f32 %v240_v29, %v237_v26  ;;  %v243_v42 = vmul.f32 %v201_v3, %v498_v19  ;;  %v261_v14 = vld [vmem:[#allocation2 + $0x62] sm:$0xff] }
  0x39   :  { %v190_v45 = vadd.f32 %v189_v44, %v187_v33  ;;  %v217_v46 = vadd.f32 %v216_v35, %v214_v34  ;;  %v226_v47 = vmul.f32 %v225_v25, %v512_v31  ;;  %v246_v9 = vmul.f32 %v225_v25, %v500_v22 }
  0x3a   :  { %v137_v37 = vadd.f32 %v136_v36, %v130_v21  ;;  %v163_v43 = vadd.f32 %v162_v61, %v160_v30  ;;  %v244_v52 = vadd.f32 %v243_v42, %v241_v41  ;;  %v249_v38 = vmul.f32 %v502_v23, %v481_v10  ;;  %v285_v21 = vld [vmem:[#allocation2 + $0x70] sm:$0xff]  ;;  %v315_v42 = vld [vmem:[#allocation2 + $0x80] sm:$0xff] }
  0x3b   :  { %v193_v36 = vadd.f32 %v192_v7, %v190_v45  ;;  %v220_v55 = vadd.f32 %v219_v50, %v217_v46  ;;  %v229_v56 = vmul.f32 %v507_v27, %v481_v10  ;;  %v232_v44 = vmul.f32 %v231_v49, %v514_v32 }
  0x3c   :  { %v144_v51 = vadd.f32 %v143_v54, %v137_v37  ;;  %v167_v53 = vadd.f32 %v166_v62, %v163_v43  ;;  %v247_v58 = vadd.f32 %v246_v9, %v244_v52  ;;  %v267_v59 = vmul.f32 %v225_v25, %v494_v16 }
  0x3d   :  { %v270_v54 = vmul.f32 %v496_v18, %v481_v10  ;;  %v197_v61 = vadd.f32 %v196_v8, %v193_v36  ;;  %v223_v0 = vadd.f32 %v222_v40, %v220_v55  ;;  %v252_v62 = vmul.f32 %v231_v49, %v509_v28  ;;  %v291_v40 = vld [vmem:[#allocation2 + $0x72] sm:$0xff] }
  0x3e   :  { %145 = vst [vmem:[#allocation8] sm:$0xff] %v144_v51  ;;  %v170_v60 = vadd.f32 %v520_v39, %v167_v53  ;;  %v250_v50 = vadd.f32 %v249_v38, %v247_v58  ;;  %v256_v1 = vmul.f32 %v255_v57, %v512_v31  ;;  %v273_v3 = vmul.f32 %v231_v49, %v498_v19 }
  0x3f   :  { %v271_v2 = vadd.f32 %v270_v54, %v267_v59  ;;  %v200_v5 = vadd.f32 %v528_v48, %v197_v61  ;;  %v227_v6 = vadd.f32 %v226_v47, %v223_v0  ;;  %v259_v7 = vmul.f32 %v507_v27, %v483_v11  ;;  %v321_v59 = vld [vmem:[#allocation2 + $0x82] sm:$0xff]  ;;  %v347_v61 = vld [vmem:[#allocation2 + $0x91] sm:$0xff] }
  0x40   :  { %v173_v4 = vadd.f32 %v172_v63, %v170_v60  ;;  %v253_v10 = vadd.f32 %v252_v62, %v250_v50  ;;  %v276_v8 = vmul.f32 %v255_v57, %v500_v22  ;;  %v279_v15 = vmul.f32 %v502_v23, %v483_v11 }
  0x41   :  { %v274_v39 = vadd.f32 %v273_v3, %v271_v2  ;;  %v203_v17 = vadd.f32 %v202_v24, %v200_v5  ;;  %v230_v20 = vadd.f32 %v229_v56, %v227_v6  ;;  %v297_v63 = vmul.f32 %v255_v57, %v494_v16  ;;  %v350_v5 = vld [vmem:[#allocation2 + $0x92] sm:$0xff] }
  0x42   :  { %175 = vst [vmem:[#allocation8 + $0x8] sm:$0xff] %v173_v4  ;;  %v300_v48 = vmul.f32 %v496_v18, %v483_v11  ;;  %v257_v25 = vadd.f32 %v256_v1, %v253_v10  ;;  %v262_v30 = vmul.f32 %v261_v14, %v514_v32  ;;  %v303_v34 = vmul.f32 %v261_v14, %v498_v19 }
  0x43   :  { %v277_v26 = vadd.f32 %v276_v8, %v274_v39  ;;  %205 = vst [vmem:[#allocation8 + $0x10] sm:$0xff] %v203_v17  ;;  %v233_v29 = vadd.f32 %v232_v44, %v230_v20  ;;  %v282_v24 = vmul.f32 %v261_v14, %v509_v28  ;;  %v306_v41 = vmul.f32 %v285_v21, %v500_v22 }
  0x44   :  { %v301_v33 = vadd.f32 %v300_v48, %v297_v63  ;;  %v260_v35 = vadd.f32 %v259_v7, %v257_v25  ;;  %v309_v11 = vmul.f32 %v502_v23, %v488_v12  ;;  %v327_v45 = vmul.f32 %v285_v21, %v494_v16 }
  0x45   :  { %v280_v37 = vadd.f32 %v279_v15, %v277_v26  ;;  %235 = vst [vmem:[#allocation8 + $0x18] sm:$0xff] %v233_v29  ;;  %v330_v46 = vmul.f32 %v496_v18, %v488_v12  ;;  %v286_v51 = vmul.f32 %v285_v21, %v512_v31  ;;  %v289_v52 = vmul.f32 %v507_v27, %v488_v12 }
  0x46   :  { %v304_v43 = vadd.f32 %v303_v34, %v301_v33  ;;  %v263_v47 = vadd.f32 %v262_v30, %v260_v35  ;;  %v333_v53 = vmul.f32 %v291_v40, %v498_v19  ;;  %v336_v36 = vmul.f32 %v315_v42, %v500_v22 }
  0x47   :  { %v283_v49 = vadd.f32 %v282_v24, %v280_v37  ;;  %v331_v38 = vadd.f32 %v330_v46, %v327_v45  ;;  %v312_v16 = vmul.f32 %v291_v40, %v509_v28  ;;  %v339_v18 = vmul.f32 %v502_v23, %v490_v13 }
  0x48   :  { %v307_v9 = vadd.f32 %v306_v41, %v304_v43  ;;  %265 = vst [vmem:[#allocation8 + $0x20] sm:$0xff] %v263_v47  ;;  %v292_v58 = vmul.f32 %v291_v40, %v514_v32  ;;  %v316_v54 = vmul.f32 %v315_v42, %v512_v31  ;;  %v319_v19 = vmul.f32 %v507_v27, %v490_v13 }
  0x49   :  { %v287_v55 = vadd.f32 %v286_v51, %v283_v49  ;;  %v334_v57 = vadd.f32 %v333_v53, %v331_v38  ;;  %v342_v50 = vmul.f32 %v321_v59, %v509_v28  ;;  %v345_v1 = vmul.f32 0.0, %v512_v31 }
  0x4a   :  { %v310_v56 = vadd.f32 %v309_v11, %v307_v9  ;;  %v322_v2 = vmul.f32 %v321_v59, %v514_v32  ;;  %v348_v4 = vmul.f32 %v347_v61, %v507_v27  ;;  %v351_v10 = vmul.f32 %v350_v5, %v514_v32 }
  0x4b   :  { %v290_v44 = vadd.f32 %v289_v52, %v287_v55  ;;  %v337_v22 = vadd.f32 %v336_v36, %v334_v57 }
  0x4c   :  { %v313_v12 = vadd.f32 %v312_v16, %v310_v56 }
  0x4d   :  { %v293_v60 = vadd.f32 %v292_v58, %v290_v44  ;;  %v340_v62 = vadd.f32 %v339_v18, %v337_v22 }
  0x4e   :  { %v317_v0 = vadd.f32 %v316_v54, %v313_v12 }
  0x4f   :  { %295 = vst [vmem:[#allocation8 + $0x28] sm:$0xff] %v293_v60  ;;  %v343_v3 = vadd.f32 %v342_v50, %v340_v62 }
  0x50   :  { %v320_v23 = vadd.f32 %v319_v19, %v317_v0 }
  0x51   :  { %v346_v7 = vadd.f32 %v345_v1, %v343_v3 }
  0x52   :  { %v323_v6 = vadd.f32 %v322_v2, %v320_v23 }
  0x53   :  { %v349_v13 = vadd.f32 %v348_v4, %v346_v7 }
  0x54   :  { %325 = vst [vmem:[#allocation8 + $0x30] sm:$0xff] %v323_v6 }
  0x55   :  { %v352_v14 = vadd.f32 %v351_v10, %v349_v13 }
  0x57   :  { %354 = vst [vmem:[#allocation8 + $0x38] sm:$0xff] %v352_v14 }
  0x58   :  { %432 = shalt.err (!%p429_p0)
}
  0x59   :  { %366 = dma.vmem_to_hbm [thread:$0]  %s361_s1, 1024, %s612_s2, [#allocation5], %s448_s12, %s448_s12, %s449_s13  }
  0x5a   :  { %445 = dma.done.wait [#allocation5], 1024  }
  0x5b   :  { %446 = vsyncadd [#allocation5], 4294966272 }
  0x5c   :  { %370 = vsyncpa [#allocation4], 1 }
  0x5d   :  { %371 = vsyncpa [#allocation7], 1 }
  0x5e   :  { %372 = vsyncpa [#allocation5], 1 }

</bundles_post_ra>
